<compile_context>
chip_gen: v6e
topology: v6e:2x2x1
jax: 0.10.0
libtpu: 0.0.40
codegen_flags: <defaults>
</compile_context>

<pallas_src>
import functools

import jax
import jax.numpy as jnp
from jax import lax
from jax.experimental import pallas as pl
from jax.experimental.pallas import tpu as pltpu


def _round_up(x, m):
    return (x + m - 1) // m * m


# ----------------------------- Pallas kernel --------------------------------
def _pae_decoder_kernel(coords_ref, zbias_ref, pec_ref, w0_ref, wres_ref,
                        bres_ref, wout_ref, bout_ref, o_ref, *,
                        players, bf16_act):
    """One (batch, points-tile) step: PE + residual MLP on the MXU/VPU/EUP."""
    c = coords_ref[0]                            # (2, TM) f32, points in lanes
    c0 = c[0:1, :]                               # (1, TM)
    c1 = c[1:2, :]                               # (1, TM)

    # Positional encoding, points-in-lanes, one fused sin (cos == sin(x+pi/2)):
    #   arg[j, m] = fb0[j]*c0[m] + fb1[j]*c1[m] + phase[j]
    # pec columns: 0 -> [f,f,0,0], 1 -> [0,0,f,f], 2 -> [0,pi/2,0,pi/2]
    arg = pec_ref[:, 0:1] * c0 + pec_ref[:, 1:2] * c1 + pec_ref[:, 2:3]
    pe = jnp.sin(arg)                            # (4E, TM) f32

    # Input projection: h = pe^T @ w0_pe.  Contraction on dim 0 of both
    # operands (flash-attention-bwd pattern) -> the MXU consumes the
    # transposed lhs; output lands points-on-sublanes as (TM, pdim).
    h = lax.dot_general(pe.astype(jnp.bfloat16), w0_ref[...],
                        (((0,), (0,)), ((), ())),
                        preferred_element_type=jnp.float32)
    # z-latent + input bias were folded host-side into a per-batch bias.
    h = jnp.maximum(h + zbias_ref[0], 0.0)       # (TM, pdim) f32
    act_dtype = jnp.bfloat16 if bf16_act else jnp.float32
    h = h.astype(act_dtype)

    # Residual blocks: h = relu(W h + b + h)
    def layer(l, h):
        r = jnp.dot(h.astype(jnp.bfloat16), wres_ref[l],
                    preferred_element_type=jnp.float32)
        h = jnp.maximum(r + bres_ref[l] + h.astype(jnp.float32), 0.0)
        return h.astype(act_dtype)

    if players <= 4:
        for l in range(players):                 # small: full unroll
            h = layer(l, h)
    else:
        # Large player counts: bound live ranges to avoid vreg spills.
        h = lax.fori_loop(0, players, layer, h, unroll=False)

    # Output projection (lane-dense outdim; bf16 writeback, f32 accumulation).
    out = jnp.dot(h.astype(jnp.bfloat16), wout_ref[...],
                  preferred_element_type=jnp.float32)
    o_ref[0] = (out + bout_ref[...]).astype(o_ref.dtype)


# ------------------------------ JAX wrapper ----------------------------------
def _choose_tile(B, N, tile_n):
    """Point tile: multiple of 128 lanes, >=2 total grid steps when possible."""
    lane = 128
    tile = max(lane, min(_round_up(tile_n, lane), _round_up(N, lane)))
    # v7x has 2 TensorCores: a (1,1) grid leaves one idle.
    if B * pl.cdiv(N, tile) < 2 and N > lane:
        tile = _round_up(pl.cdiv(N, 2), lane)
    return tile


def pae_forward(coords, z, kparams, *, players, tile_n=2048,
                out_dtype=jnp.bfloat16, bf16_act=False):
    """PAE.forward: decode(coords, z) with kernel-ready (prepared) params.

    bf16_act=True keeps the residual activation stream in bf16 between layers
    (v6e/v7x only: they have a bf16 VPU; keep False on v5e).
    """
    B, N, two = coords.shape
    assert two == 2
    zdim = kparams["w0_z"].shape[0]
    assert z.shape == (B, zdim)

    enc4 = kparams["pec"].shape[0]               # 4 * enc_dim
    pdim = kparams["w0_pe"].shape[1]
    outdim = kparams["wout"].shape[1]

    # Fold the latent + input bias into a per-batch bias:
    #   zbias[b] = z[b] @ w0_z + b0     (tiny (B,zdim)@(zdim,pdim) matmul, f32)
    zbias = (z @ kparams["w0_z"] + kparams["b0"]).reshape(B, 1, pdim)

    # Lane-dense coords: (B, 2, N) -> per-tile block is (2, tile) instead of
    # (tile, 2) lane-padded to (tile, 128): 64x less coords VMEM, dense DMA.
    coords_t = jnp.transpose(coords, (0, 2, 1))

    tile = _choose_tile(B, N, tile_n)
    n_pad = pl.cdiv(N, tile) * tile
    if n_pad != N:
        coords_t = jnp.pad(coords_t, ((0, 0), (0, 0), (0, n_pad - N)))
    grid = (B, n_pad // tile)

    # --- VMEM budget (bytes) -> explicit scoped-VMEM limit. -----------------
    lane = 128
    o_sz = jnp.dtype(out_dtype).itemsize
    pdim_l = _round_up(pdim, lane)
    outdim_l = _round_up(outdim, lane)
    vmem_est = (
        2 * 8 * tile * 4                                # coords blocks x2 bufs
        + 2 * tile * outdim_l * o_sz                    # output blocks x2 bufs
        + 2 * 8 * pdim_l * 4                            # zbias blocks  x2 bufs
        + (_round_up(enc4, 8) * pdim_l                  # bf16 weights  x1 buf
           + players * _round_up(pdim, 8) * pdim_l
           + _round_up(pdim, 8) * outdim_l) * 2
        + _round_up(enc4, 8) * lane * 4                 # pec           x1 buf
        + players * 8 * pdim_l * 4 + 8 * outdim_l * 4   # bres, bout    x1 buf
        + 6 * tile * max(pdim_l, outdim_l) * 4          # live intermediates
    )
    vmem_limit = int(min(max(32 << 20, int(vmem_est * 1.25)), 112 << 20))
    # NOTE(v7x): physical VMEM is 64 MiB/TC.  If vmem_est approaches that,
    # shrink tile_n (512-1024) instead of raising the limit further.

    flops = 2 * B * N * (enc4 * pdim + players * pdim * pdim + pdim * outdim)
    weight_bytes = sum(int(kparams[k].size) * kparams[k].dtype.itemsize
                       for k in ("pec", "w0_pe", "wres", "bres", "wout", "bout"))
    cost = pl.CostEstimate(
        flops=flops,
        transcendentals=B * N * enc4,
        bytes_accessed=int(coords_t.size) * 4 + int(zbias.size) * 4
                       + weight_bytes + B * n_pad * outdim * o_sz,
    )

    kernel = functools.partial(_pae_decoder_kernel, players=players,
                               bf16_act=bf16_act)
    const1 = pl.Buffered(1)   # constant-index inputs: single VMEM buffer

    out = pl.pallas_call(
        kernel,
        out_shape=jax.ShapeDtypeStruct((B, n_pad, outdim), out_dtype),
        grid=grid,
        in_specs=[
            pl.BlockSpec((1, 2, tile), lambda b, i: (b, 0, i)),      # coords
            pl.BlockSpec((1, 1, pdim), lambda b, i: (b, 0, 0)),      # zbias
            pl.BlockSpec(kparams["pec"].shape, lambda b, i: (0, 0),
                         pipeline_mode=const1),                      # PE consts
            pl.BlockSpec(kparams["w0_pe"].shape, lambda b, i: (0, 0),
                         pipeline_mode=const1),
            pl.BlockSpec(kparams["wres"].shape, lambda b, i: (0, 0, 0),
                         pipeline_mode=const1),
            pl.BlockSpec(kparams["bres"].shape, lambda b, i: (0, 0, 0),
                         pipeline_mode=const1),
            pl.BlockSpec(kparams["wout"].shape, lambda b, i: (0, 0),
                         pipeline_mode=const1),
            pl.BlockSpec(kparams["bout"].shape, lambda b, i: (0, 0),
                         pipeline_mode=const1),
        ],
        out_specs=pl.BlockSpec((1, tile, outdim), lambda b, i: (b, i, 0)),
        compiler_params=pltpu.CompilerParams(
            dimension_semantics=("parallel", "parallel"),
            vmem_limit_bytes=vmem_limit),
        cost_estimate=cost,
    )(coords_t, zbias, kparams["pec"], kparams["w0_pe"], kparams["wres"],
      kparams["bres"], kparams["wout"], kparams["bout"])

    return out[:, :N, :]


# --------------------------- parameter preparation ---------------------------
def prepare_pae_params(p, *, zdim):
    """Turn f32 master params into the kernel layout: bf16 matmul weights,
    merged PE band/phase constants (columns of a single (4E,3) array), and
    w0 split into PE rows (kernel) / z rows (folded host-side)."""
    f = p["freqs"][0]                                    # (E,) f32
    E = f.shape[0]
    zeros = jnp.zeros_like(f)
    half_pi = jnp.full_like(f, jnp.pi / 2.0)
    pec = jnp.stack([
        jnp.concatenate([f, f, zeros, zeros]),           # multiplies coord 0
        jnp.concatenate([zeros, zeros, f, f]),           # multiplies coord 1
        jnp.concatenate([zeros, half_pi, zeros, half_pi]),  # phase (cos rows)
    ], axis=1)                                           # (4E, 3)
    return {
        "pec": pec,
        "w0_pe": p["w0"][:4 * E].astype(jnp.bfloat16),
        "w0_z": p["w0"][4 * E:4 * E + zdim],             # f32 (used host-side)
        "b0": p["b0"],                                   # f32 (folded into zbias)
        "wres": p["wres"].astype(jnp.bfloat16),
        "bres": p["bres"],
        "wout": p["wout"].astype(jnp.bfloat16),
        "bout": p["bout"],
    }


# -------------------------- pure-JAX reference -------------------------------
def pae_forward_ref(coords, z, params, *, zdim, players):
    """Reference in the original formulation (sin/cos PE, cat z, residual MLP).
    Matmul operands are cast to bf16 with f32 accumulation to mirror the
    kernel's MXU precision, so the self-test isolates wiring, not precision."""
    B, N, _ = coords.shape
    enc_dim = params["freqs"].shape[1]
    x = coords.reshape(B * N, 2)
    c0, c1 = x[:, 0:1], x[:, 1:2]
    f = params["freqs"]
    k0, k1 = c0 * f, c1 * f
    pe = jnp.concatenate(
        [jnp.sin(k0), jnp.cos(k0), jnp.sin(k1), jnp.cos(k1)], axis=-1)

    def bdot(a, w):
        return jnp.dot(a.astype(jnp.bfloat16), w.astype(jnp.bfloat16),
                       preferred_element_type=jnp.float32)

    w0 = params["w0"]
    # cat(pe, z) @ w0  ==  pe @ w0[:4E]  +  z @ w0[4E:]   (exact split)
    zbias = z @ w0[4 * enc_dim:4 * enc_dim + zdim] + params["b0"]   # (B, pdim)
    zbias = jnp.repeat(zbias, N, axis=0)                            # (B*N, pdim)
    h = jnp.maximum(bdot(pe, w0[:4 * enc_dim]) + zbias, 0.0)
    for l in range(players):
        h = jnp.maximum(bdot(h, params["wres"][l]) + params["bres"][l] + h, 0.0)
    out = bdot(h, params["wout"]) + params["bout"]
    return out.reshape(B, N, -1)


# ----------------------------- parameter init --------------------------------
def init_pae_params(key, *, D, zdim, players, pdim, outdim, pe_alpha):
    enc_dim = D // 2
    in_features = 4 * enc_dim + zdim
    ks = jax.random.split(key, 3 + players)

    freqs = (pe_alpha * jnp.pi *
             jnp.arange(1, enc_dim + 1, dtype=jnp.float32)).reshape(1, enc_dim)

    def lin(k, fan_in, fan_out):
        return jax.random.normal(k, (fan_in, fan_out), jnp.float32) / jnp.sqrt(
            jnp.float32(fan_in))

    return {
        "freqs": freqs,
        "w0": lin(ks[0], in_features, pdim),
        "b0": jnp.zeros((1, pdim), jnp.float32),
        "wres": jnp.stack([lin(ks[1 + l], pdim, pdim) for l in range(players)]),
        "bres": jnp.zeros((players, 1, pdim), jnp.float32),
        "wout": lin(ks[1 + players], pdim, outdim),
        "bout": jnp.zeros((1, outdim), jnp.float32),
    }


# ----------------------------------- main -------------------------------------
if __name__ == "__main__":
    # Small, lane-friendly configuration of PAE(D, qlayers, qdim, players, pdim,
    # in_dim, zdim, outdim, pe_alpha). qlayers/qdim/in_dim feed the (unused-in-
    # forward) encoder and are not instantiated here.
    D, players, pdim, zdim, outdim, pe_alpha = 16, 2, 32, 1, 128, 1.0
    # N > tile and N % tile != 0 so the multi-tile grid + padding path is
    # exercised (per review's validation-gap note); tile_n=128 keeps it small.
    B, N = 2, 200

    key = jax.random.PRNGKey(0)
    k_par, k_c, k_z = jax.random.split(key, 3)

    params = init_pae_params(k_par, D=D, zdim=zdim, players=players,
                             pdim=pdim, outdim=outdim, pe_alpha=pe_alpha)
    kparams = prepare_pae_params(params, zdim=zdim)

    coords = jax.random.uniform(k_c, (B, N, 2), jnp.float32,
                                minval=-0.5, maxval=0.5)
    z = jax.random.normal(k_z, (B, zdim), jnp.float32)

    out = pae_forward(coords, z, kparams, players=players, tile_n=128)
    out = jax.block_until_ready(out)

    ref = pae_forward_ref(coords, z, params, zdim=zdim, players=players)
    assert out.shape == (B, N, outdim), out.shape
    out_f32 = out.astype(jnp.float32)
    # Output is bf16 (review item): tolerance covers the final bf16 rounding.
    if not jnp.allclose(out_f32, ref, rtol=3e-2, atol=3e-2):
        err = jnp.max(jnp.abs(out_f32 - ref))
        raise AssertionError(f"Pallas PAE kernel mismatch vs JAX reference: {err}")

    print("KERNEL_OK")
</pallas_src>

<mosaic_0001>
module attributes {stable_mosaic.version = 11 : i64} {
  func.func @_pae_decoder_kernel(%arg0: i32, %arg1: i32, %arg2: memref<1x2x128xf32, #tpu.memory_space<vmem>>, %arg3: memref<1x1x32xf32, #tpu.memory_space<vmem>>, %arg4: memref<32x3xf32, #tpu.memory_space<vmem>>, %arg5: memref<32x32xbf16, #tpu.memory_space<vmem>>, %arg6: memref<2x32x32xbf16, #tpu.memory_space<vmem>>, %arg7: memref<2x1x32xf32, #tpu.memory_space<vmem>>, %arg8: memref<32x128xbf16, #tpu.memory_space<vmem>>, %arg9: memref<1x128xf32, #tpu.memory_space<vmem>>, %arg10: memref<1x128x128xbf16, #tpu.memory_space<vmem>>) attributes {dimension_semantics = [#tpu.dimension_semantics<parallel>, #tpu.dimension_semantics<parallel>], iteration_bounds = array<i64: 2, 2>, scalar_prefetch = 0 : i64, scratch_operands = 0 : i64, tpu.core_type = #tpu.core_type<tc>, window_params = [{transform_indices = @transform_0, window_bounds = array<i64: 1, 2, 128>}, {transform_indices = @transform_1, window_bounds = array<i64: 1, 1, 32>}, {pipeline_mode = #tpu.pipeline_mode<synchronous>, transform_indices = @transform_2, window_bounds = array<i64: 32, 3>}, {pipeline_mode = #tpu.pipeline_mode<synchronous>, transform_indices = @transform_3, window_bounds = array<i64: 32, 32>}, {pipeline_mode = #tpu.pipeline_mode<synchronous>, transform_indices = @transform_4, window_bounds = array<i64: 2, 32, 32>}, {pipeline_mode = #tpu.pipeline_mode<synchronous>, transform_indices = @transform_5, window_bounds = array<i64: 2, 1, 32>}, {pipeline_mode = #tpu.pipeline_mode<synchronous>, transform_indices = @transform_6, window_bounds = array<i64: 32, 128>}, {pipeline_mode = #tpu.pipeline_mode<synchronous>, transform_indices = @transform_7, window_bounds = array<i64: 1, 128>}, {transform_indices = @transform_8, window_bounds = array<i64: 1, 128, 128>}]} {
    %c0 = arith.constant 0 : index
    %c0_0 = arith.constant 0 : index
    %c0_1 = arith.constant 0 : index
    %0 = vector.load %arg2[%c0, %c0_0, %c0_1] : memref<1x2x128xf32, #tpu.memory_space<vmem>>, vector<1x2x128xf32>
    %1 = vector.shape_cast %0 : vector<1x2x128xf32> to vector<2x128xf32>
    %2 = vector.extract_strided_slice %1 {offsets = [0, 0], sizes = [1, 128], strides = [1, 1]} : vector<2x128xf32> to vector<1x128xf32>
    %3 = vector.extract_strided_slice %1 {offsets = [1, 0], sizes = [1, 128], strides = [1, 1]} : vector<2x128xf32> to vector<1x128xf32>
    %c0_2 = arith.constant 0 : index
    %c0_3 = arith.constant 0 : index
    %4 = vector.load %arg4[%c0_2, %c0_3] : memref<32x3xf32, #tpu.memory_space<vmem>>, vector<32x1xf32>
    %5 = vector.broadcast %4 : vector<32x1xf32> to vector<32x128xf32>
    %6 = vector.broadcast %2 : vector<1x128xf32> to vector<32x128xf32>
    %7 = arith.mulf %5, %6 : vector<32x128xf32>
    %c0_4 = arith.constant 0 : index
    %c1 = arith.constant 1 : index
    %8 = vector.load %arg4[%c0_4, %c1] : memref<32x3xf32, #tpu.memory_space<vmem>>, vector<32x1xf32>
    %9 = vector.broadcast %8 : vector<32x1xf32> to vector<32x128xf32>
    %10 = vector.broadcast %3 : vector<1x128xf32> to vector<32x128xf32>
    %11 = arith.mulf %9, %10 : vector<32x128xf32>
    %12 = arith.addf %7, %11 : vector<32x128xf32>
    %c0_5 = arith.constant 0 : index
    %c2 = arith.constant 2 : index
    %13 = vector.load %arg4[%c0_5, %c2] : memref<32x3xf32, #tpu.memory_space<vmem>>, vector<32x1xf32>
    %14 = vector.broadcast %13 : vector<32x1xf32> to vector<32x128xf32>
    %15 = arith.addf %12, %14 : vector<32x128xf32>
    %16 = math.sin %15 : vector<32x128xf32>
    %17 = arith.truncf %16 : vector<32x128xf32> to vector<32x128xbf16>
    %c0_6 = arith.constant 0 : index
    %c0_7 = arith.constant 0 : index
    %18 = vector.load %arg5[%c0_6, %c0_7] : memref<32x32xbf16, #tpu.memory_space<vmem>>, vector<32x32xbf16>
    %cst = arith.constant dense<0.000000e+00> : vector<128x32xf32>
    %19 = tpu.matmul %17, %18, %cst {dimension_numbers = #tpu.dot_dimension_numbers<[0], [0], [1], [1], [0, 1, 1, 1], [], []>} : vector<32x128xbf16>, vector<32x32xbf16>, vector<128x32xf32> -> vector<128x32xf32>
    %c0_8 = arith.constant 0 : index
    %c0_9 = arith.constant 0 : index
    %c0_10 = arith.constant 0 : index
    %20 = vector.load %arg3[%c0_8, %c0_9, %c0_10] : memref<1x1x32xf32, #tpu.memory_space<vmem>>, vector<1x1x32xf32>
    %21 = vector.shape_cast %20 : vector<1x1x32xf32> to vector<1x32xf32>
    %22 = vector.broadcast %21 : vector<1x32xf32> to vector<128x32xf32>
    %23 = arith.addf %19, %22 : vector<128x32xf32>
    %cst_11 = arith.constant 0.000000e+00 : f32
    %24 = vector.broadcast %cst_11 : f32 to vector<128x32xf32>
    %25 = arith.maximumf %23, %24 : vector<128x32xf32>
    %26 = arith.truncf %25 : vector<128x32xf32> to vector<128x32xbf16>
    %c0_12 = arith.constant 0 : index
    %c0_13 = arith.constant 0 : index
    %c0_14 = arith.constant 0 : index
    %27 = vector.load %arg6[%c0_12, %c0_13, %c0_14] : memref<2x32x32xbf16, #tpu.memory_space<vmem>>, vector<1x32x32xbf16>
    %28 = vector.shape_cast %27 : vector<1x32x32xbf16> to vector<32x32xbf16>
    %cst_15 = arith.constant dense<0.000000e+00> : vector<128x32xf32>
    %29 = tpu.matmul %26, %28, %cst_15 {dimension_numbers = #tpu.dot_dimension_numbers<[1], [0], [0], [1], [0, 0, 1, 1], [], []>} : vector<128x32xbf16>, vector<32x32xbf16>, vector<128x32xf32> -> vector<128x32xf32>
    %c0_16 = arith.constant 0 : index
    %c0_17 = arith.constant 0 : index
    %c0_18 = arith.constant 0 : index
    %30 = vector.load %arg7[%c0_16, %c0_17, %c0_18] : memref<2x1x32xf32, #tpu.memory_space<vmem>>, vector<1x1x32xf32>
    %31 = vector.shape_cast %30 : vector<1x1x32xf32> to vector<1x32xf32>
    %32 = vector.broadcast %31 : vector<1x32xf32> to vector<128x32xf32>
    %33 = arith.addf %29, %32 : vector<128x32xf32>
    %34 = arith.addf %33, %25 : vector<128x32xf32>
    %cst_19 = arith.constant 0.000000e+00 : f32
    %35 = vector.broadcast %cst_19 : f32 to vector<128x32xf32>
    %36 = arith.maximumf %34, %35 : vector<128x32xf32>
    %37 = arith.truncf %36 : vector<128x32xf32> to vector<128x32xbf16>
    %c1_20 = arith.constant 1 : index
    %c0_21 = arith.constant 0 : index
    %c0_22 = arith.constant 0 : index
    %38 = vector.load %arg6[%c1_20, %c0_21, %c0_22] : memref<2x32x32xbf16, #tpu.memory_space<vmem>>, vector<1x32x32xbf16>
    %39 = vector.shape_cast %38 : vector<1x32x32xbf16> to vector<32x32xbf16>
    %cst_23 = arith.constant dense<0.000000e+00> : vector<128x32xf32>
    %40 = tpu.matmul %37, %39, %cst_23 {dimension_numbers = #tpu.dot_dimension_numbers<[1], [0], [0], [1], [0, 0, 1, 1], [], []>} : vector<128x32xbf16>, vector<32x32xbf16>, vector<128x32xf32> -> vector<128x32xf32>
    %c1_24 = arith.constant 1 : index
    %c0_25 = arith.constant 0 : index
    %c0_26 = arith.constant 0 : index
    %41 = vector.load %arg7[%c1_24, %c0_25, %c0_26] : memref<2x1x32xf32, #tpu.memory_space<vmem>>, vector<1x1x32xf32>
    %42 = vector.shape_cast %41 : vector<1x1x32xf32> to vector<1x32xf32>
    %43 = vector.broadcast %42 : vector<1x32xf32> to vector<128x32xf32>
    %44 = arith.addf %40, %43 : vector<128x32xf32>
    %45 = arith.addf %44, %36 : vector<128x32xf32>
    %cst_27 = arith.constant 0.000000e+00 : f32
    %46 = vector.broadcast %cst_27 : f32 to vector<128x32xf32>
    %47 = arith.maximumf %45, %46 : vector<128x32xf32>
    %48 = arith.truncf %47 : vector<128x32xf32> to vector<128x32xbf16>
    %c0_28 = arith.constant 0 : index
    %c0_29 = arith.constant 0 : index
    %49 = vector.load %arg8[%c0_28, %c0_29] : memref<32x128xbf16, #tpu.memory_space<vmem>>, vector<32x128xbf16>
    %cst_30 = arith.constant dense<0.000000e+00> : vector<128x128xf32>
    %50 = tpu.matmul %48, %49, %cst_30 {dimension_numbers = #tpu.dot_dimension_numbers<[1], [0], [0], [1], [0, 0, 1, 1], [], []>} : vector<128x32xbf16>, vector<32x128xbf16>, vector<128x128xf32> -> vector<128x128xf32>
    %c0_31 = arith.constant 0 : index
    %c0_32 = arith.constant 0 : index
    %51 = vector.load %arg9[%c0_31, %c0_32] : memref<1x128xf32, #tpu.memory_space<vmem>>, vector<1x128xf32>
    %52 = vector.broadcast %51 : vector<1x128xf32> to vector<128x128xf32>
    %53 = arith.addf %50, %52 : vector<128x128xf32>
    %54 = arith.truncf %53 : vector<128x128xf32> to vector<128x128xbf16>
    %c0_33 = arith.constant 0 : index
    %c0_34 = arith.constant 0 : index
    %c0_35 = arith.constant 0 : index
    %55 = vector.load %arg10[%c0_33, %c0_34, %c0_35] : memref<1x128x128xbf16, #tpu.memory_space<vmem>>, vector<1x128x128xbf16>
    %56 = vector.shape_cast %55 : vector<1x128x128xbf16> to vector<128x128xbf16>
    %57 = vector.shape_cast %54 : vector<128x128xbf16> to vector<1x128x128xbf16>
    tpu.vector_store %arg10[%c0_33, %c0_34, %c0_35], %57 {strides = array<i32>} : memref<1x128x128xbf16, #tpu.memory_space<vmem>>, vector<1x128x128xbf16>,
    return
  }
  func.func @transform_0(%arg0: i32, %arg1: i32) -> (i32, i32, i32) {
    %c0_i32 = arith.constant 0 : i32
    %c0_i32_0 = arith.constant 0 : i32
    return %arg0, %c0_i32, %arg1 : i32, i32, i32
  }
  func.func @transform_1(%arg0: i32, %arg1: i32) -> (i32, i32, i32) {
    %c0_i32 = arith.constant 0 : i32
    %c0_i32_0 = arith.constant 0 : i32
    %c0_i32_1 = arith.constant 0 : i32
    return %arg0, %c0_i32, %c0_i32_0 : i32, i32, i32
  }
  func.func @transform_2(%arg0: i32, %arg1: i32) -> (i32, i32) {
    %c0_i32 = arith.constant 0 : i32
    %c0_i32_0 = arith.constant 0 : i32
    %c0_i32_1 = arith.constant 0 : i32
    return %c0_i32, %c0_i32_0 : i32, i32
  }
  func.func @transform_3(%arg0: i32, %arg1: i32) -> (i32, i32) {
    %c0_i32 = arith.constant 0 : i32
    %c0_i32_0 = arith.constant 0 : i32
    %c0_i32_1 = arith.constant 0 : i32
    return %c0_i32, %c0_i32_0 : i32, i32
  }
  func.func @transform_4(%arg0: i32, %arg1: i32) -> (i32, i32, i32) {
    %c0_i32 = arith.constant 0 : i32
    %c0_i32_0 = arith.constant 0 : i32
    %c0_i32_1 = arith.constant 0 : i32
    %c0_i32_2 = arith.constant 0 : i32
    return %c0_i32, %c0_i32_0, %c0_i32_1 : i32, i32, i32
  }
  func.func @transform_5(%arg0: i32, %arg1: i32) -> (i32, i32, i32) {
    %c0_i32 = arith.constant 0 : i32
    %c0_i32_0 = arith.constant 0 : i32
    %c0_i32_1 = arith.constant 0 : i32
    %c0_i32_2 = arith.constant 0 : i32
    return %c0_i32, %c0_i32_0, %c0_i32_1 : i32, i32, i32
  }
  func.func @transform_6(%arg0: i32, %arg1: i32) -> (i32, i32) {
    %c0_i32 = arith.constant 0 : i32
    %c0_i32_0 = arith.constant 0 : i32
    %c0_i32_1 = arith.constant 0 : i32
    return %c0_i32, %c0_i32_0 : i32, i32
  }
  func.func @transform_7(%arg0: i32, %arg1: i32) -> (i32, i32) {
    %c0_i32 = arith.constant 0 : i32
    %c0_i32_0 = arith.constant 0 : i32
    %c0_i32_1 = arith.constant 0 : i32
    return %c0_i32, %c0_i32_0 : i32, i32
  }
  func.func @transform_8(%arg0: i32, %arg1: i32) -> (i32, i32, i32) {
    %c0_i32 = arith.constant 0 : i32
    %c0_i32_0 = arith.constant 0 : i32
    return %arg0, %arg1, %c0_i32 : i32, i32, i32
  }
}

</mosaic_0001>

<bundles_post_ra>
// kernel: tpu_custom_call.1
= control target key start
LH: loop header
LB: loop body
LE: loop exit
PB: predicated region body
PF: predicated region fallthrough
CT: control target
= control target key end

     0   :  { %13 = vsyncpa [#allocation3], 0  ;;  %s3231_s0 = inlined_call_operand.vmem [shape: f32[2,2,256], index: 0, kind: input, shape index: {}]   ;;  %s3232_s1 = inlined_call_operand.vmem [shape: f32[2,1,32], index: 1, kind: input, shape index: {}]   ;;  %s3233_s2 = inlined_call_operand.vmem [shape: f32[32,3], index: 2, kind: input, shape index: {}]   ;;  %s3234_s3 = inlined_call_operand.hbm [shape: bf16[32,32], index: 3, kind: input, shape index: {}]   ;;  %s3235_s4 = inlined_call_operand.vmem [shape: bf16[2,32,32], index: 4, kind: input, shape index: {}]   ;;  %s3236_s5 = inlined_call_operand.vmem [shape: f32[2,1,32], index: 5, kind: input, shape index: {}]   ;;  %s3237_s6 = inlined_call_operand.hbm [shape: bf16[32,128], index: 6, kind: input, shape index: {}]   ;;  %s3238_s7 = inlined_call_operand.vmem [shape: f32[1,128], index: 7, kind: input, shape index: {}]   ;;  %s3239_s8 = inlined_call_operand.hbm [shape: bf16[2,256,128], index: 8, kind: output, shape index: {}]  }
   0x1   :  { %14 = vsyncpa [#allocation6], 0 }
   0x2   :  { %15 = vsyncpa [#allocation4], 0 }
   0x3   :  { %17 = vsyncpa [#allocation4 + $0x1], 0  ;;  %s2431_s27 = smov 0   ;;  %s2433_s28 = smov 0  }
   0x4   :  { %s2435_s29 = smov 0   ;;  %s2437_s30 = smov 0  }
   0x5   :  { %s2439_s9 = smov 0   ;;  %s2441_s10 = smov 0  }
   0x6   :  { %s2443_s11 = smov 0   ;;  %s2445_s12 = smov 0  }
   0x7 LB: > { %3244 = sst [smem:[#allocation11_spill]] %s2360_s10  ;;  %s1782_s13 = sadd.s32 4294967295, %s2368_s12   ;;  %s2368_s12 = sphi %s2445_s12, %s23_s12   ;;  %s2364_s11 = sphi %s2443_s11, %s3262_s11   ;;  %s2360_s10 = sphi %s2441_s10, %s3261_s10   ;;  %s2356_s9 = sphi %s2439_s9, %s3260_s9   ;;  %s2352_s30 = sphi %s2437_s30, %s3259_s30   ;;  %s2348_s29 = sphi %s2435_s29, %s3265_s29   ;;  %s2344_s28 = sphi %s2433_s28, %s3264_s28   ;;  %s2340_s27 = sphi %s2431_s27, %s3263_s27  }
   0x8   : > { %3245 = sst [smem:[#allocation12_spill]] %s2364_s11  ;;  %s1783_s14 = sadd.s32 4294967294, %s2368_s12  }
   0x9   : > { %s32_s15 = sadd.s32 1, %s2360_s10  ;;  %s35_s16 = sadd.s32 1, %s2364_s11 }
   0xa   : > { %p33_p0 = scmp.ge.s32.totalorder %s32_s15, 2  ;;  %s224_s17 = sadd.s32 1, %s2348_s29 }
   0xb   : > { %p234_p1 = scmp.ne.s32.totalorder %s2348_s29, %s2344_s28  ;;  %p235_p2 = scmp.eq.s32.totalorder %s1782_s13, 3 }
   0xc   : > { %s3267_s15 = smov (%p33_p0, %s32_s15), 0  ;;  %s3269_s16 = smov (!%p33_p0, %s35_s16), %s2364_s11 }
   0xd   : > { %3246 = sst [smem:[#allocation13_spill]] %s3267_s15  ;;  %s220_s18 = ssub.s32 %s2360_s10, %s3267_s15 }
   0xe   : > { %p2483_p3 = por %p235_p2, %p234_p1  ;;  %p37_p4 = scmp.ge.s32.totalorder %s3269_s16, 2 }
   0xf   : > { %p240_p5 = scmp.ne.s32.totalorder %s2344_s28, %s2340_s27  ;;  %p241_p6 = scmp.eq.s32.totalorder %s1783_s14, 3 }
  0x10   : > { %p1784_p7 = scmp.ge.s32.totalorder %s2368_s12, 1  ;;  %s3271_s16 = smov (%p37_p4, %s3269_s16), 0 }
  0x11   : > { %3248 = sst [smem:[#allocation14_spill]] %s3271_s16  ;;  %p2492_p8 = por %p241_p6, %p240_p5 }
  0x12   : > { %p248_p9 = scmp.lt.s32.totalorder %s2368_s12, 5  ;;  %s219_s21 = ssub.s32 %s2364_s11, %s3271_s16 }
  0x13   : > { %s221_s22 = sor.u32 %s220_s18, %s219_s21  ;;  %p2503_p12 = scmp.eq.s32.totalorder %s1782_s13, 0 }
  0x14   : > { %p2499_p10 = pnand %p1784_p7, %p248_p9  ;;  %p222_p11 = scmp.eq.s32.totalorder %s221_s22, 0 }
  0x15   : > { %s2370_s26 = smov [#allocation2]  }
  0x16   : > { %p2090_p13 = pneg %p2499_p10  ;;  %s263_s14 = sshll.u32 %s2370_s26, 4  ;;  %s264_s14 = int_to_ptr.vmem [resolvable:$true] %s263_s14 }
  0x17   : > { %s2510_s25 = scalar_select %p222_p11, %s2348_s29, %s224_s17  }
  0x18   : > { %p2514_p0 = pnand %p2503_p12, %p2090_p13  ;;  %s2227_s13 = scalar_lea.vmem %s264_s14, 256 }
  0x19   : > { %p2228_p2 = scmp.ne.s32.totalorder %s264_s14, %s2227_s13  ;;  %p2235_p6 = scmp.lt.s32.totalorder %s264_s14, %s264_s14 }
  0x1a   : > { %p2218_p1 = pneg %p2514_p0  ;;  %p2236_p7 = scmp.lt.s32.totalorder %s2227_s13, %s2227_s13 }
  0x1c   : > { %p2230_p4 = pnand %p2228_p2, %p2218_p1  ;;  %p2237_p9 = por %p2236_p7, %p2235_p6 }
  0x1e   : > { %p2231_p5 = pneg %p2230_p4 }
  0x20   : > { %p2238_p11 = pnand %p2237_p9, %p2231_p5 }
  0x22   : > { %2241 = shalt.err (!%p2238_p11)
}
  0x23   : > { %s2371_s17 = smov 64   ;;  %s2372_s21 = smov 4  }
  0x24   : > { %2093 = dma.hbm_to_vmem [thread:$0]  (!%p2514_p0), %s3234_s3, 256, %s264_s14, [#allocation3], %s2371_s17, %s2371_s17, %s2372_s21  }
  0x25   : > { %s2373_s16 = smov [#allocation5]  }
  0x26   : > { %s282_s15 = sshll.u32 %s2373_s16, 4  ;;  %s283_s15 = int_to_ptr.vmem [resolvable:$true] %s282_s15 }
  0x27   : > { %s2253_s11 = scalar_lea.vmem %s283_s15, 256  ;;  %p2261_p5 = scmp.lt.s32.totalorder %s283_s15, %s283_s15 }
  0x28   : > { %p2254_p13 = scmp.ne.s32.totalorder %s283_s15, %s2253_s11  ;;  %p2262_p6 = scmp.lt.s32.totalorder %s2253_s11, %s2253_s11 }
  0x2a   : > { %p2256_p2 = pnand %p2254_p13, %p2218_p1  ;;  %p2263_p7 = por %p2262_p6, %p2261_p5 }
  0x2c   : > { %p2257_p4 = pneg %p2256_p2 }
  0x2e   : > { %p2264_p9 = pnand %p2263_p7, %p2257_p4 }
  0x30   : > { %2267 = shalt.err (!%p2264_p9)
}
  0x31   : > { %2096 = dma.hbm_to_vmem [thread:$0]  (!%p2514_p0), %s3237_s6, 256, %s283_s15, [#allocation6], %s2371_s17, %s2371_s17, %s2372_s21  }
  0x32   : > { %318 = sbr.rel (%p2499_p10) target bundleno = 1304 (0x518), region = 52 }
  0x37   : > { %2327 = dma.done.wait (%p2503_p12), [#allocation3], 256  }
  0x38   : > { %2329 = vsyncadd (%p2503_p12), [#allocation3], 4294967040 }
  0x39   : > { %2331 = dma.done.wait (%p2503_p12), [#allocation6], 256  }
  0x3a   : > { %2333 = vsyncadd (%p2503_p12), [#allocation6], 4294967040  ;;  %v2374_v0 = vmov 1   ;;  %v2375_v1 = vmov 0   ;;  %v376_v2 = vld [vmem:[%s3233_s2] sm:$0xff]  ;;  %v377_v3 = vld [vmem:[%s3233_s2 + $0x8] sm:$0xff]  ;;  %v400_v7 = vlaneseq }
  0x3b   : > { %2186 = vset.pattern.permute.xlu1 %v2374_v0  ;;  %2185 = vset.pattern.permute.xlu0 %v2375_v1  ;;  %v378_v4 = vld [vmem:[%s3233_s2 + $0x10] sm:$0xff]  ;;  %v379_v5 = vld [vmem:[%s3233_s2 + $0x18] sm:$0xff]  ;;  %v2376_v6 = vmov 2   ;;  %p362_p10 = scmp.lt.s32.totalorder %s2356_s9, 1  ;;  %p364_p12 = scmp.lt.s32.totalorder %s2352_s30, 1 }
  0x3c   : > { %409 = vperm.xlu1 %2186, %v376_v2   ;;  %382 = vperm.xlu0 %2185, %v376_v2   ;;  %v401_v10 = vshrl.u32 %v400_v7, 7  ;;  %v2378_v7 = vmov 2475754826   ;;  %s359_s14 = sand.u32 1, %s2344_s28   ;;  %s2383_s24 = smov [#allocation7]  }
  0x3d   : > { %s2561_s17 = scalar_select %p362_p10, %s2356_s9, 1 }
  0x3e   : > { %s365_s21 = scalar_select %p364_p12, %s2352_s30, 1  ;;  %v426_v13 = vsub.s32 1, %v401_v10  ;;  %v402_v14 = vsub.s32 0, %v401_v10  ;;  %v2379_v10 = vmov 2131351028  }
  0x3f   : > { %s1792_s22 = sshll.u32 %s2561_s17, 1  ;;  %s372_s11 = scalar_lea.vmem %s3232_s1, %s2561_s17 }
  0x40   : > { %413 = vperm.xlu1 %2186, %v377_v3   ;;  %387 = vperm.xlu0 %2185, %v377_v3   ;;  %s367_s26 = sadd.s32 %s1792_s22, %s365_s21  ;;  %s1791_s21 = sshll.u32 %s359_s14, 6 }
  0x41   : > { %s1793_s13 = sshll.u32 %s367_s26, 1  ;;  %s3158_s22 = scalar_lea.vmem [#allocation7], %s1791_s21 }
  0x42   : > { %s369_s15 = scalar_lea.vmem %s3231_s0, %s1793_s13  ;;  %s1876_s26 = sshll.u32 %s2352_s30, 4 }
  0x43   : > { %v375_v15 = vld [vmem:[%s369_s15] sm:$0x3]  ;;  %s1877_s13 = sshll.u32 %s2356_s9, 5  ;;  %s3180_s16 = scalar_lea.sflag [#allocation4], %s359_s14 }
  0x44   : > { %2187 = vset.pattern.permute.xlu1 %v2375_v1  ;;  %392 = vperm.xlu0 %2185, %v378_v4   ;;  %v427_v18 = vrot.slane %v375_v15, %v426_v13  ;;  %v403_v19 = vrot.slane %v375_v15, %v402_v14  ;;  %v2381_v14 = vmov 920167782   ;;  %s1666_s10 = sadd.s32 %s1877_s13, %s1876_s26  ;;  %s2272_s18 = sshll.u32 %s2383_s24, 4  ;;  %s2273_s18 = int_to_ptr.vmem [resolvable:$false] %s2272_s18 }
  0x45   : > { %397 = vperm.xlu1 %2187, %v379_v5   ;;  %s1878_s17 = sshll.u32 %s1666_s10, 6  ;;  %s2274_s21 = scalar_lea.vmem %s2273_s18, 2048 }
  0x46   : > { %s3174_s15 = scalar_lea.hbm %s3239_s8, %s1878_s17 }
  0x48   : > { %2188 = vset.pattern.permute.xlu0 %v2374_v0 }
  0x49   : > { %2189 = vset.pattern.permute.xlu1 %v2374_v0  ;;  %417 = vperm.xlu0 %2188, %v378_v4  }
  0x4a   : > { %421 = vperm.xlu1 %2189, %v379_v5  }
  0x4d   : > { %2191 = vset.pattern.permute.xlu0 %v2376_v6 }
  0x4e   : > { %2190 = vset.pattern.permute.xlu1 %v2376_v6  ;;  %441 = vperm.xlu0 %2191, %v377_v3  }
  0x4f   : > { %437 = vperm.xlu1 %2190, %v376_v2  }
  0x53   : > { %445 = vperm.xlu1 %2190, %v378_v4  }
  0x57   : > { %449 = vperm.xlu1 %2190, %v379_v5   ;;  %v2377_v5 = vmov 683565275  }
  0xb7   : > { %v410_v8 = vpop.permute.xlu1 %409  ;;  %v383_v9 = vpop.permute.xlu0 %382 }
  0xb8   : > { %v428_v23 = vmul.f32 %v427_v18, %v410_v8  ;;  %v404_v24 = vmul.f32 %v403_v19, %v383_v9 }
  0xba   : > { %v432_v29 = vadd.f32 %v428_v23, %v404_v24 }
  0xbb   : > { %v414_v11 = vpop.permute.xlu1 %413  ;;  %v388_v12 = vpop.permute.xlu0 %387 }
  0xbc   : > { %v429_v20 = vmul.f32 %v427_v18, %v414_v11  ;;  %v405_v21 = vmul.f32 %v403_v19, %v388_v12  ;;  %v2380_v12 = vmov 2102212464  }
  0xbe   : > { %v433_v26 = vadd.f32 %v429_v20, %v405_v21 }
  0xbf   : > { %v393_v16 = vpop.permute.xlu0 %392 }
  0xc0   : > { %v398_v17 = vpop.permute.xlu1 %397  ;;  %v406_v32 = vmul.f32 %v403_v19, %v393_v16 }
  0xc1   : > { %v407_v52 = vmul.f32 %v403_v19, %v398_v17  ;;  %v2192_v19 = vld [vmem:[#allocation2 + $0x8] sm:$0xff]  }
  0xc2   : > { %1984 = vmatprep.subr.bf16.mxu0 %v2192_v19 }
  0xc3   : > { %1985 = vmatpush3.bf16.msra.mxu0 %v2192_v19 }
  0xc4   : > { %v418_v22 = vpop.permute.xlu0 %417 }
  0xc5   : > { %v422_v25 = vpop.permute.xlu1 %421  ;;  %v430_v27 = vmul.f32 %v427_v18, %v418_v22  ;;  %v2382_v22 = vmov 1326507024  }
  0xc6   : > { %v431_v46 = vmul.f32 %v427_v18, %v422_v25 }
  0xc7   : > { %v434_v38 = vadd.f32 %v430_v27, %v406_v32 }
  0xc8   : > { %v435_v59 = vadd.f32 %v431_v46, %v407_v52 }
  0xc9   : > { %v442_v28 = vpop.permute.xlu0 %441 }
  0xca   : > { %v2568_v30 = vadd.f32 %v442_v28, %v433_v26  ;;  %v438_v31 = vpop.permute.xlu1 %437 }
  0xcb   : > { %v2570_v33 = vadd.f32 %v438_v31, %v432_v29 }
  0xcc   : > { %v560_v34 = vand.u32 2147483647, %v2568_v30  ;;  %v563_v35 = vand.u32 2139095040, %v2568_v30 }
  0xcd   : > { %v456_v36 = vand.u32 2147483647, %v2570_v33  ;;  %v459_v37 = vand.u32 2139095040, %v2570_v33 }
  0xce   : > { %v564_v39 = vshrl.u32 %v563_v35, 23  ;;  %v567_v40 = vand.u32 8388607, %v560_v34  ;;  %v446_v41 = vpop.permute.xlu1 %445 }
  0xcf   : > { %v460_v42 = vshrl.u32 %v459_v37, 23  ;;  %v463_v43 = vand.u32 8388607, %v456_v36  ;;  %v2580_v44 = vadd.f32 %v446_v41, %v434_v38 }
  0xd0   : > { %v1798_v45 = vadd.s32 4294967169, %v564_v39  ;;  %v568_v47 = vor.u32 8388608, %v567_v40 }
  0xd1   : > { %v1794_v48 = vadd.s32 4294967169, %v460_v42  ;;  %v464_v50 = vor.u32 8388608, %v463_v43  ;;  %v667_v51 = vand.u32 2139095040, %v2580_v44  ;;  %v664_v54 = vand.u32 2147483647, %v2580_v44 }
  0xd2   : > { %v570_v49 = vadd.s32 1, %v1798_v45  ;;  %v450_v56 = vpop.permute.xlu1 %449  ;;  %v2584_v58 = vshll.u32 %v568_v47, 8 }
  0xd3   : > { %v466_v53 = vadd.s32 1, %v1794_v48  ;;  %v668_v55 = vshrl.u32 %v667_v51, 23  ;;  %v2586_v63 = vshll.u32 %v464_v50, 8  ;;  %v2594_v2 = vand.u32 8388607, %v664_v54 }
  0xd4   : > { %vm571_vm0 = vcmp.gt.s32.totalorder %v570_v49, 0  ;;  %v2596_v3 = vadd.f32 %v450_v56, %v435_v59 }
  0xd5   : > { %v572_v57 = vsel %vm571_vm0, %v570_v49, 0  ;;  %vm467_vm1 = vcmp.gt.s32.totalorder %v466_v53, 0  ;;  %v2590_v1 = vadd.s32 4294967169, %v668_v55 }
  0xd6   : > { %v573_v60 = vshrl.u32 %v572_v57, 5  ;;  %v574_v61 = vand.u32 31, %v572_v57  ;;  %v468_v62 = vsel %vm467_vm1, %v466_v53, 0 }
  0xd7   : > { %v2588_v0 = vshrl.u32 %v468_v62, 5  ;;  %v470_v9 = vand.u32 31, %v468_v62 }
  0xd8   : > { %v575_v4 = vsub.s32 32, %v574_v61  ;;  %v577_v6 = vshll.u32 %v2377_v5, %v574_v61  ;;  %v580_v8 = vshll.u32 %v2378_v7, %v574_v61  ;;  %v583_v11 = vshll.u32 %v2379_v10, %v574_v61 }
  0xd9   : > { %v586_v13 = vshll.u32 %v2380_v12, %v574_v61  ;;  %v589_v15 = vshll.u32 %v2381_v14, %v574_v61  ;;  %vm592_vm2 = vcmp.lt.s32.totalorder %v573_v60, 1  ;;  %vm593_vm3 = vcmp.lt.s32.totalorder %v573_v60, 2 }
  0xda   : > { %v578_v16 = vshrl.u32 %v2378_v7, %v575_v4  ;;  %v581_v17 = vshrl.u32 %v2379_v10, %v575_v4  ;;  %v584_v18 = vshrl.u32 %v2380_v12, %v575_v4  ;;  %v576_v20 = vshrl.u32 %v2377_v5, %v575_v4 }
  0xdb   : > { %v587_v21 = vshrl.u32 %v2381_v14, %v575_v4  ;;  %v590_v23 = vshrl.u32 %v2382_v22, %v575_v4  ;;  %vm594_vm4 = vcmp.lt.s32.totalorder %v573_v60, 3  ;;  %v471_v27 = vsub.s32 32, %v470_v9 }
  0xdc   : > { %v579_v24 = vor.u32 %v578_v16, %v577_v6  ;;  %v582_v25 = vor.u32 %v581_v17, %v580_v8  ;;  %v585_v26 = vor.u32 %v584_v18, %v583_v11  ;;  %vm595_vm5 = vcmp.lt.s32.totalorder %v573_v60, 4 }
  0xdd   : > { %v588_v28 = vor.u32 %v587_v21, %v586_v13  ;;  %v591_v29 = vor.u32 %v590_v23, %v589_v15  ;;  %v473_v31 = vshll.u32 %v2377_v5, %v470_v9  ;;  %v476_v42 = vshll.u32 %v2378_v7, %v470_v9 }
  0xde   : > { %v596_v32 = vsel %vm592_vm2, %v576_v20, %v579_v24  ;;  %v597_v35 = vsel %vm595_vm5, %v585_v26, 2102212464  ;;  %v600_v37 = vsel %vm592_vm2, %v579_v24, %v582_v25  ;;  %v604_v38 = vsel %vm592_vm2, %v582_v25, %v585_v26 }
  0xdf   : > { %v598_v39 = vsel %vm594_vm4, %v582_v25, %v597_v35  ;;  %v601_v40 = vsel %vm595_vm5, %v588_v28, 920167782  ;;  %v605_v41 = vsel %vm595_vm5, %v591_v29, 1326507024  ;;  %v472_v46 = vshrl.u32 %v2377_v5, %v471_v27 }
  0xe0   : > { %v602_v43 = vsel %vm594_vm4, %v585_v26, %v601_v40  ;;  %v606_v45 = vsel %vm594_vm4, %v588_v28, %v605_v41  ;;  %v474_v47 = vshrl.u32 %v2378_v7, %v471_v27  ;;  %v599_v48 = vsel %vm593_vm3, %v596_v32, %v598_v39 }
  0xe1   : > { %v603_v49 = vsel %vm593_vm3, %v600_v37, %v602_v43  ;;  %v607_v50 = vsel %vm593_vm3, %v604_v38, %v606_v45  ;;  %v477_v51 = vshrl.u32 %v2379_v10, %v471_v27  ;;  %v479_v61 = vshll.u32 %v2379_v10, %v470_v9 }
  0xe2   : > { %v2624_v52 = vmul.u32.u64.low %v2584_v58, %v607_v50  ;;  %v2625_v53 = vmul.u32.u64.high %v2584_v58, %v607_v50, %v2624_v52  ;;  %v2628_v55 = vmul.u32.u64.low %v2584_v58, %v603_v49  ;;  %v2629_v56 = vmul.u32.u64.high %v2584_v58, %v603_v49, %v2628_v55 }
  0xe3   : > { %v475_v57 = vor.u32 %v474_v47, %v473_v31  ;;  %v478_v59 = vor.u32 %v477_v51, %v476_v42  ;;  %v480_v62 = vshrl.u32 %v2380_v12, %v471_v27  ;;  %v615_v60 = vmul.u32 %v2584_v58, %v599_v48 }
  0xe4   : > { %v482_v4 = vshll.u32 %v2380_v12, %v470_v9  ;;  %v483_v6 = vshrl.u32 %v2381_v14, %v471_v27  ;;  %v486_v8 = vshrl.u32 %v2382_v22, %v471_v27  ;;  %v485_v13 = vshll.u32 %v2381_v14, %v470_v9 }
  0xe5   : > { %v481_v11 = vor.u32 %v480_v62, %v479_v61  ;;  %vm488_vm6 = vcmp.lt.s32.totalorder %v2588_v0, 1  ;;  %vm489_vm7 = vcmp.lt.s32.totalorder %v2588_v0, 2  ;;  %vm617_vm8 = vc.u32 %v2625_v53, %v2628_v55 }
  0xe6   : > { %v618_v15 = vadd.s32 1, %v2629_v56  ;;  %v484_v16 = vor.u32 %v483_v6, %v482_v4  ;;  %vm490_vm9 = vcmp.lt.s32.totalorder %v2588_v0, 3  ;;  %v487_v58 = vor.u32 %v486_v8, %v485_v13 }
  0xe7   : > { %vm491_vm10 = vcmp.lt.s32.totalorder %v2588_v0, 4  ;;  %v492_v17 = vsel %vm488_vm6, %v472_v46, %v475_v57  ;;  %v496_v18 = vsel %vm488_vm6, %v475_v57, %v478_v59  ;;  %v500_v21 = vsel %vm488_vm6, %v478_v59, %v481_v11 }
  0xe8   : > { %v619_v19 = vsel %vm617_vm8, %v618_v15, %v2629_v56  ;;  %v493_v9 = vsel %vm491_vm10, %v481_v11, 2102212464  ;;  %v497_v20 = vsel %vm491_vm10, %v484_v16, 920167782  ;;  %v501_v26 = vsel %vm491_vm10, %v487_v58, 1326507024 }
  0xe9   : > { %v620_v23 = vadd.s32 %v619_v19, %v615_v60  ;;  %v494_v24 = vsel %vm490_vm9, %v478_v59, %v493_v9  ;;  %v498_v25 = vsel %vm490_vm9, %v481_v11, %v497_v20  ;;  %v502_v28 = vsel %vm490_vm9, %v484_v16, %v501_v26 }
  0xea   : > { %v499_v27 = vsel %vm489_vm7, %v496_v18, %v498_v25  ;;  %v672_v29 = vor.u32 8388608, %v2594_v2  ;;  %v674_v31 = vadd.s32 1, %v2590_v1  ;;  %v503_v35 = vsel %vm489_vm7, %v500_v21, %v502_v28 }
  0xeb   : > { %v621_v32 = vadd.s32 536870912, %v620_v23  ;;  %v2654_v37 = vmul.u32.u64.low %v2586_v63, %v499_v27  ;;  %v2655_v38 = vmul.u32.u64.high %v2586_v63, %v499_v27, %v2654_v37  ;;  %v495_v39 = vsel %vm489_vm7, %v492_v17, %v494_v24 }
  0xec   : > { %v2661_v40 = vmul.u32.u64.low %v2586_v63, %v503_v35  ;;  %v2662_v41 = vmul.u32.u64.high %v2586_v63, %v503_v35, %v2661_v40  ;;  %vm675_vm11 = vcmp.gt.s32.totalorder %v674_v31, 0  ;;  %v511_v45 = vmul.u32 %v2586_v63, %v495_v39 }
  0xed   : > { %v2664_v2 = vshrl.u32 %v621_v32, 30  ;;  %v676_v1 = vsel %vm675_vm11, %v674_v31, 0  ;;  %v514_v46 = vadd.s32 1, %v2655_v38  ;;  %v2669_v47 = vshll.u32 %v672_v29, 8 }
  0xee   : > { %v678_v42 = vand.u32 31, %v676_v1  ;;  %vm513_vm12 = vc.u32 %v2662_v41, %v2654_v37  ;;  %v677_v0 = vshrl.u32 %v676_v1, 5  ;;  %v771_v49 = vand.u32 2139095040, %v2596_v3 }
  0xef   : > { %v623_v43 = vshll.u32 %v2664_v2, 30  ;;  %v515_v51 = vsel %vm513_vm12, %v514_v46, %v2655_v38  ;;  %vm562_vm2 = vcmp.lt.s32.totalorder %v2568_v30, 0  ;;  %vm2715_vm6 = vcmp.le.f32.partialorder %v560_v34, 0.7853982 }
  0xf0   : > { %v679_v48 = vsub.s32 32, %v678_v42  ;;  %v681_v52 = vshll.u32 %v2377_v5, %v678_v42  ;;  %v684_v56 = vshll.u32 %v2378_v7, %v678_v42  ;;  %v516_v57 = vadd.s32 %v515_v51, %v511_v45 }
  0xf1   : > { %v624_v50 = vsub.s32 %v620_v23, %v623_v43  ;;  %v687_v61 = vshll.u32 %v2379_v10, %v678_v42  ;;  %v690_v4 = vshll.u32 %v2380_v12, %v678_v42  ;;  %v693_v15 = vshll.u32 %v2381_v14, %v678_v42 }
  0xf2   : > { %v682_v63 = vshrl.u32 %v2378_v7, %v679_v48  ;;  %v685_v59 = vshrl.u32 %v2379_v10, %v679_v48  ;;  %v688_v60 = vshrl.u32 %v2380_v12, %v679_v48  ;;  %v691_v6 = vshrl.u32 %v2381_v14, %v679_v48 }
  0xf3   : > { %v626_v62 = vsub.s32 0, %v624_v50  ;;  %v517_v8 = vadd.s32 536870912, %v516_v57  ;;  %v694_v18 = vshrl.u32 %v2382_v22, %v679_v48  ;;  %v680_v9 = vshrl.u32 %v2377_v5, %v679_v48 }
  0xf4   : > { %v683_v11 = vor.u32 %v682_v63, %v681_v52  ;;  %v686_v13 = vor.u32 %v685_v59, %v684_v56  ;;  %v689_v58 = vor.u32 %v688_v60, %v687_v61  ;;  %v692_v17 = vor.u32 %v691_v6, %v690_v4 }
  0xf5   : > { %v1799_v16 = vmin.u32 %v626_v62, %v624_v50  ;;  %v2685_v19 = vshrl.u32 %v517_v8, 30  ;;  %vm696_vm13 = vcmp.lt.s32.totalorder %v677_v0, 1  ;;  %vm697_vm14 = vcmp.lt.s32.totalorder %v677_v0, 2 }
  0xf6   : > { %v695_v21 = vor.u32 %v694_v18, %v693_v15  ;;  %vm698_vm15 = vcmp.lt.s32.totalorder %v677_v0, 3  ;;  %vm699_vm0 = vcmp.lt.s32.totalorder %v677_v0, 4  ;;  %v704_v25 = vsel %vm696_vm13, %v683_v11, %v686_v13 }
  0xf7   : > { %v628_v20 = vclz %v1799_v16  ;;  %v519_v23 = vshll.u32 %v2685_v19, 30  ;;  %v701_v24 = vsel %vm699_vm0, %v689_v58, 2102212464  ;;  %v705_v26 = vsel %vm699_vm0, %v692_v17, 920167782 }
  0xf8   : > { %v700_v28 = vsel %vm696_vm13, %v680_v9, %v683_v11  ;;  %v706_v29 = vsel %vm698_vm15, %v689_v58, %v705_v26  ;;  %v708_v31 = vsel %vm696_vm13, %v686_v13, %v689_v58  ;;  %v702_v35 = vsel %vm698_vm15, %v686_v13, %v701_v24 }
  0xf9   : > { %v1800_v27 = vadd.s32 4294967294, %v628_v20  ;;  %v520_v32 = vsub.s32 %v516_v57, %v519_v23  ;;  %v707_v38 = vsel %vm697_vm14, %v704_v25, %v706_v29  ;;  %v709_v39 = vsel %vm699_vm0, %v695_v21, 1326507024 }
  0xfa   : > { %v710_v40 = vsel %vm698_vm15, %v692_v17, %v709_v39  ;;  %v2691_v1 = vmul.u32.u64.low %v2669_v47, %v707_v38  ;;  %v2692_v42 = vmul.u32.u64.high %v2669_v47, %v707_v38, %v2691_v1  ;;  %v616_v43 = vadd.s32 %v2628_v55, %v2625_v53 }
  0xfb   : > { %vm1801_vm1 = vcmp.lt.s32.totalorder %v1800_v27, 0  ;;  %v522_v46 = vsub.s32 0, %v520_v32  ;;  %v711_v48 = vsel %vm697_vm14, %v708_v31, %v710_v40  ;;  %v703_v56 = vsel %vm697_vm14, %v700_v28, %v702_v35 }
  0xfc   : > { %v631_v45 = vsel %vm1801_vm1, 0, %v1800_v27  ;;  %v772_v57 = vshrl.u32 %v771_v49, 23  ;;  %v2700_v61 = vmul.u32.u64.low %v2669_v47, %v711_v48  ;;  %v2701_v62 = vmul.u32.u64.high %v2669_v47, %v711_v48, %v2700_v61 }
  0xfd   : > { %v632_v51 = vsub.s32 32, %v631_v45  ;;  %v636_v52 = vsub.s32 4294967266, %v631_v45  ;;  %v633_v63 = vshll.u32 %v624_v50, %v631_v45  ;;  %v1795_v59 = vmin.u32 %v522_v46, %v520_v32 }
  0xfe   : > { %v722_v6 = vadd.s32 1, %v2692_v42  ;;  %v1806_v53 = vadd.s32 4294967169, %v772_v57  ;;  %v719_v49 = vmul.u32 %v2669_v47, %v703_v56  ;;  %vm721_vm3 = vc.u32 %v2701_v62, %v2691_v1 }
  0xff   : > { %v634_v60 = vshrl.u32 %v616_v43, %v632_v51  ;;  %v637_v4 = vadd.s32 127, %v636_v52  ;;  %v524_v55 = vclz %v1795_v59  ;;  %v768_v16 = vand.u32 2147483647, %v2596_v3 }
 0x100   : > { %v778_v13 = vadd.s32 1, %v1806_v53  ;;  %v723_v15 = vsel %vm721_vm3, %v722_v6, %v2692_v42  ;;  %v646_v18 = vsub.s32 4, %v2664_v2  ;;  %v512_v47 = vadd.s32 %v2654_v37, %v2662_v41 }
 0x101   : > { %v635_v8 = vor.u32 %v634_v60, %v633_v63  ;;  %v638_v11 = vshll.u32 %v637_v4, 23  ;;  %v1796_v0 = vadd.s32 4294967294, %v524_v55  ;;  %v724_v58 = vadd.s32 %v723_v15, %v719_v49 }
 0x102   : > { %vm779_vm4 = vcmp.gt.s32.totalorder %v778_v13, 0  ;;  %v2721_v29 = vand.u32 8388607, %v768_v16  ;;  %vm458_vm7 = vcmp.lt.s32.totalorder %v2570_v33, 0  ;;  %v542_v42 = vsub.s32 4, %v2685_v19 }
 0x103   : > { %v639_v50 = vor.u32 4788187, %v638_v11  ;;  %vm1797_vm5 = vcmp.lt.s32.totalorder %v1796_v0, 0  ;;  %v780_v17 = vsel %vm779_vm4, %v778_v13, 0  ;;  %v642_v20 = vcvt.s32.f32 %v635_v8 }
 0x104   : > { %v527_v21 = vsel %vm1797_vm5, 0, %v1796_v0  ;;  %v782_v23 = vand.u32 31, %v780_v17  ;;  %v725_v26 = vadd.s32 536870912, %v724_v58  ;;  %v647_v48 = vsel %vm562_vm2, %v646_v18, %v2664_v2 }
 0x105   : > { %v640_v9 = vand.u32 2147483647, %v639_v50  ;;  %v528_v24 = vsub.s32 32, %v527_v21  ;;  %v532_v25 = vsub.s32 4294967266, %v527_v21  ;;  %v529_v35 = vshll.u32 %v520_v32, %v527_v21 }
 0x106   : > { %v783_v31 = vsub.s32 32, %v782_v23  ;;  %v2724_v41 = vshrl.u32 %v725_v26, 30  ;;  %v2735_v51 = vshrl.u32 %v780_v17, 5  ;;  %v785_v52 = vshll.u32 %v2377_v5, %v782_v23 }
 0x107   : > { %v643_v28 = vmul.f32 %v642_v20, %v640_v9  ;;  %v530_v38 = vshrl.u32 %v512_v47, %v528_v24  ;;  %v533_v37 = vadd.s32 127, %v532_v25  ;;  %v788_v56 = vshll.u32 %v2378_v7, %v782_v23 }
 0x108   : > { %v786_v40 = vshrl.u32 %v2378_v7, %v783_v31  ;;  %v789_v34 = vshrl.u32 %v2379_v10, %v783_v31  ;;  %v727_v46 = vshll.u32 %v2724_v41, 30  ;;  %vm2744_vm8 = vcmp.le.f32.partialorder %v456_v36, 0.7853982 }
 0x109   : > { %v644_v39 = vxor.u32 2147483648, %v643_v28  ;;  %v531_v43 = vor.u32 %v530_v38, %v529_v35  ;;  %v534_v45 = vshll.u32 %v533_v37, 23  ;;  %v792_v61 = vshrl.u32 %v2380_v12, %v783_v31 }
 0x10a   : > { %v2748_v59 = vsub.s32 %v724_v58, %v727_v46  ;;  %v787_v60 = vor.u32 %v786_v40, %v785_v52  ;;  %v790_v4 = vor.u32 %v789_v34, %v788_v56  ;;  %v791_v7 = vshll.u32 %v2379_v10, %v782_v23 }
 0x10b   : > { %v645_v32 = vsel %vm562_vm2, %v644_v39, %v643_v28  ;;  %v535_v2 = vor.u32 4788187, %v534_v45  ;;  %v538_v53 = vcvt.s32.f32 %v531_v43  ;;  %v794_v36 = vshll.u32 %v2380_v12, %v782_v23 }
 0x10c   : > { %v648_v57 = vsel %vm2715_vm6, %v2568_v30, %v645_v32  ;;  %v730_v55 = vsub.s32 0, %v2748_v59  ;;  %v795_v8 = vshrl.u32 %v2381_v14, %v783_v31  ;;  %v797_v11 = vshll.u32 %v2381_v14, %v782_v23 }
 0x10d   : > { %2200 = vcosq.f32 %v648_v57  ;;  %v536_v6 = vand.u32 2147483647, %v535_v2  ;;  %v798_v13 = vshrl.u32 %v2382_v22, %v783_v31  ;;  %v776_v50 = vor.u32 8388608, %v2721_v29 }
 0x10e   : > { %2202 = vsinq.f32 %v648_v57  ;;  %v1803_v49 = vmin.u32 %v730_v55, %v2748_v59  ;;  %v793_v15 = vor.u32 %v792_v61, %v791_v7  ;;  %v796_v10 = vor.u32 %v795_v8, %v794_v36 }
 0x10f   : > { %v539_v0 = vmul.f32 %v538_v53, %v536_v6  ;;  %v799_v58 = vor.u32 %v798_v13, %v797_v11  ;;  %v543_v17 = vsel %vm458_vm7, %v542_v42, %v2685_v19  ;;  %v649_v12 = vsel %vm2715_vm6, 0, %v647_v48 }
 0x110   : > { %v732_v9 = vclz %v1803_v49  ;;  %vm800_vm9 = vcmp.lt.s32.totalorder %v2735_v51, 1  ;;  %vm803_vm10 = vcmp.lt.s32.totalorder %v2735_v51, 4  ;;  %v784_v14 = vshrl.u32 %v2377_v5, %v783_v31 }
 0x111   : > { %v540_v18 = vxor.u32 2147483648, %v539_v0  ;;  %vm802_vm11 = vcmp.lt.s32.totalorder %v2735_v51, 3  ;;  %v808_v22 = vsel %vm800_vm9, %v787_v60, %v790_v4  ;;  %v809_v20 = vsel %vm803_vm10, %v796_v10, 920167782 }
 0x112   : > { %v1804_v21 = vadd.s32 4294967294, %v732_v9  ;;  %v810_v23 = vsel %vm802_vm11, %v793_v15, %v809_v20  ;;  %v812_v47 = vsel %vm800_vm9, %v790_v4, %v793_v15  ;;  %vm801_vm12 = vcmp.lt.s32.totalorder %v2735_v51, 2 }
 0x113   : > { %v541_v19 = vsel %vm458_vm7, %v540_v18, %v539_v0  ;;  %v805_v24 = vsel %vm803_vm10, %v793_v15, 2102212464  ;;  %v813_v25 = vsel %vm803_vm10, %v799_v58, 1326507024  ;;  %v811_v26 = vsel %vm801_vm12, %v808_v22, %v810_v23 }
 0x114   : > { %v544_v5 = vsel %vm2744_vm8, %v2570_v33, %v541_v19  ;;  %vm1805_vm13 = vcmp.lt.s32.totalorder %v1804_v21, 0  ;;  %v814_v27 = vsel %vm802_vm11, %v796_v10, %v813_v25  ;;  %v816_v31 = vshll.u32 %v776_v50, 8 }
 0x115   : > { %2204 = vcosq.f32 %v544_v5  ;;  %v735_v28 = vsel %vm1805_vm13, 0, %v1804_v21  ;;  %v815_v29 = vsel %vm801_vm12, %v812_v47, %v814_v27  ;;  %v804_v35 = vsel %vm800_vm9, %v784_v14, %v787_v60 }
 0x116   : > { %2206 = vsinq.f32 %v544_v5  ;;  %v806_v38 = vsel %vm802_vm11, %v790_v4, %v805_v24  ;;  %v545_v37 = vsel %vm2744_vm8, 0, %v543_v17  ;;  %v653_v39 = vadd.s32 3, %v649_v12 }
 0x117   : > { %v2792_v40 = vmul.u32.u64.low %v816_v31, %v815_v29  ;;  %v2793_v34 = vmul.u32.u64.high %v816_v31, %v815_v29, %v2792_v40  ;;  %v2795_v42 = vmul.u32.u64.low %v816_v31, %v811_v26  ;;  %v2796_v43 = vmul.u32.u64.high %v816_v31, %v811_v26, %v2795_v42 }
 0x118   : > { %v740_v46 = vsub.s32 4294967266, %v735_v28  ;;  %v807_v32 = vsel %vm801_vm12, %v804_v35, %v806_v38  ;;  %v549_v52 = vadd.s32 3, %v545_v37  ;;  %v654_v56 = vand.u32 3, %v653_v39  ;;  %v2193_v39 = vld [vmem:[#allocation2] sm:$0xff]  }
 0x119   : > { %vm825_vm14 = vc.u32 %v2793_v34, %v2795_v42  ;;  %v826_v57 = vadd.s32 1, %v2796_v43  ;;  %v823_v60 = vmul.u32 %v816_v31, %v807_v32  ;;  %v736_v7 = vsub.s32 32, %v735_v28  ;;  %1986 = vmatprep.subr.bf16.mxu0 %v2193_v39 }
 0x11a   : > { %v2201_v45 = vpop.eup %2200  ;;  %v741_v61 = vadd.s32 127, %v740_v46  ;;  %vm656_vm15 = vcmp.eq.s32.totalorder %v654_v56, 0  ;;  %vm659_vm0 = vcmp.eq.s32.totalorder %v654_v56, 2  ;;  %v550_v53 = vand.u32 3, %v549_v52  ;;  %1987 = vmatpush3.bf16.msra.mxu0 %v2193_v39 }
 0x11b   : > { %v2203_v48 = vpop.eup %2202  ;;  %v660_v2 = vxor.u32 2147483648, %v2201_v45  ;;  %v827_v4 = vsel %vm825_vm14, %v826_v57, %v2796_v43  ;;  %v720_v36 = vadd.s32 %v2691_v1, %v2701_v62  ;;  %vm655_vm1 = vcmp.lt.s32.totalorder %v654_v56, 2 }
 0x11c   : > { %v657_v63 = vxor.u32 2147483648, %v2203_v48  ;;  %v828_v6 = vadd.s32 %v827_v4, %v823_v60  ;;  %v742_v8 = vshll.u32 %v741_v61, 23  ;;  %v737_v58 = vshll.u32 %v2748_v59, %v735_v28 }
 0x11d   : > { %v661_v51 = vsel %vm659_vm0, %v660_v2, %v2203_v48  ;;  %v738_v49 = vshrl.u32 %v720_v36, %v736_v7  ;;  %vm555_vm2 = vcmp.eq.s32.totalorder %v550_v53, 2  ;;  %vm652_vm3 = vweird.f32 %v2568_v30 }
 0x11e   : > { %v658_v55 = vsel %vm656_vm15, %v2201_v45, %v657_v63  ;;  %v829_v11 = vadd.s32 536870912, %v828_v6  ;;  %v743_v12 = vor.u32 4788187, %v742_v8  ;;  %vm552_vm4 = vcmp.eq.s32.totalorder %v550_v53, 0 }
 0x11f   : > { %v662_v10 = vsel %vm655_vm1, %v658_v55, %v661_v51  ;;  %vm551_vm5 = vcmp.lt.s32.totalorder %v550_v53, 2  ;;  %v739_v14 = vor.u32 %v738_v49, %v737_v58  ;;  %vm548_vm6 = vweird.f32 %v2570_v33 }
 0x120   : > { %v2805_v50 = vshrl.u32 %v829_v11, 30  ;;  %v663_v9 = vsel %vm652_vm3, nan, %v662_v10  ;;  %v744_v21 = vand.u32 2147483647, %v743_v12  ;;  %v824_v28 = vadd.s32 %v2795_v42, %v2793_v34 }
 0x121   : > { %v746_v47 = vcvt.s32.f32 %v739_v14  ;;  %vm666_vm8 = vcmp.lt.s32.totalorder %v2580_v44, 0  ;;  %vm2817_vm9 = vcmp.le.f32.partialorder %v664_v54, 0.7853982  ;;  %v750_v32 = vsub.s32 4, %v2724_v41 }
 0x122   : > { %v2205_v13 = vpop.eup %2204  ;;  %v831_v18 = vshll.u32 %v2805_v50, 30  ;;  %vm770_vm10 = vcmp.lt.s32.totalorder %v2596_v3, 0  ;;  %v854_v56 = vsub.s32 4, %v2805_v50  ;;  %vm769_vm11 = vcmp.le.f32.partialorder %v768_v16, 0.7853982 }
 0x123   : > { %v2207_v0 = vpop.eup %2206  ;;  %v556_v15 = vxor.u32 2147483648, %v2205_v13  ;;  %v747_v30 = vmul.f32 %v746_v47, %v744_v21  ;;  %v751_v57 = vsel %vm666_vm8, %v750_v32, %v2724_v41  ;;  %vm860_vm3 = vweird.f32 %v2596_v3  ;;  %v2194_v21 = vld [vmem:[%s3235_s4 + $0x8] sm:$0xff]   ;;  %v2197_v47 = vld [vmem:[%s3235_s4 + $0x10] sm:$0xff]  }
 0x124   : > { %v553_v17 = vxor.u32 2147483648, %v2207_v0  ;;  %v832_v22 = vsub.s32 %v828_v6, %v831_v18  ;;  %v753_v61 = vsel %vm2817_vm9, 0, %v751_v57  ;;  %v855_v60 = vsel %vm770_vm10, %v854_v56, %v2805_v50  ;;  %2004 = vmatprep.subr.bf16.mxu1 %v2194_v21 }
 0x125   : > { %v557_v1 = vsel %vm555_vm2, %v556_v15, %v2207_v0  ;;  %v748_v26 = vxor.u32 2147483648, %v747_v30  ;;  %v757_v4 = vadd.s32 3, %v753_v61  ;;  %v857_v7 = vsel %vm769_vm11, 0, %v855_v60  ;;  %2005 = vmatpush3.bf16.msra.mxu1 %v2194_v21  ;;  %v2953_v21 = vld [vmem:[%s3236_s5] ss:$0 sm:$0xff] }
 0x126   : > { %v554_v62 = vsel %vm552_vm4, %v2205_v13, %v553_v17  ;;  %v834_v59 = vsub.s32 0, %v832_v22  ;;  %v861_v55 = vadd.s32 3, %v857_v7  ;;  %vm756_vm2 = vweird.f32 %v2580_v44 }
 0x127   : > { %v558_v20 = vsel %vm551_vm5, %v554_v62, %v557_v1  ;;  %v749_v33 = vsel %vm666_vm8, %v748_v26, %v747_v30  ;;  %v758_v51 = vand.u32 3, %v757_v4  ;;  %vm913_vm4 = vcmask 261120  }
 0x128   : > { %v559_v19 = vsel %vm548_vm6, nan, %v558_v20  ;;  %v1807_v5 = vmin.u32 %v834_v59, %v832_v22  ;;  %v752_v34 = vsel %vm2817_vm9, %v2580_v44, %v749_v33  ;;  %v862_v8 = vand.u32 3, %v861_v55  ;;  %v2195_v59 = vld [vmem:[%s3235_s4] sm:$0xff]  }
 0x129   : > { %v872_v23 = vpack.c.bf16 %v663_v9, %v559_v19  ;;  %2208 = vcosq.f32 %v752_v34  ;;  %vm760_vm12 = vcmp.eq.s32.totalorder %v758_v51, 0  ;;  %vm763_vm13 = vcmp.eq.s32.totalorder %v758_v51, 2  ;;  %2006 = vmatprep.subr.bf16.mxu1 %v2195_v59 }
 0x12a   : > { %v836_v24 = vclz %v1807_v5  ;;  %2210 = vsinq.f32 %v752_v34  ;;  %vm759_vm14 = vcmp.lt.s32.totalorder %v758_v51, 2  ;;  %vm867_vm15 = vcmp.eq.s32.totalorder %v862_v8, 2  ;;  %2007 = vmatpush3.bf16.msra.mxu1 %v2195_v59 }
 0x12b   : > { %885 = vxpose.xlu0.c.b16.start [1/2] (short) %v872_v23, 128  ;;  %vm864_vm0 = vcmp.eq.s32.totalorder %v862_v8, 0  ;;  %vm863_vm1 = vcmp.lt.s32.totalorder %v862_v8, 2  ;;  %v2196_v23 = vld [vmem:[%s3235_s4 + $0x18] sm:$0xff]  }
 0x12c   : > { %v1808_v25 = vadd.s32 4294967294, %v836_v24  ;;  %2024 = vmatprep.subr.bf16.mxu0 %v2196_v23  ;;  %v1810_v24 = vld [vmem:[%s372_s11] ss:$0 sm:$0xff]  ;;  %s1669_s11 = sshll.u32 %s3158_s22, 4  ;;  %s3169_s11 = int_to_ptr.vmem [resolvable:$true] %s1669_s11 }
 0x12d   : > { %s2268_s23 = scalar_lea.vmem %s3169_s11, 1024  ;;  %p2275_p13 = scmp.lt.s32.totalorder %s3169_s11, %s2273_s18 }
 0x12e   : > { %vm1809_vm7 = vcmp.lt.s32.totalorder %v1808_v25, 0  ;;  %p2269_p0 = scmp.ne.s32.totalorder %s3169_s11, %s2268_s23  ;;  %p2276_p2 = scmp.lt.s32.totalorder %s2274_s21, %s2268_s23 }
 0x12f   : > { %v839_v27 = vsel %vm1809_vm7, 0, %v1808_v25 }
 0x130   : > { %v840_v29 = vsub.s32 32, %v839_v27  ;;  %v844_v31 = vsub.s32 4294967266, %v839_v27  ;;  %v841_v35 = vshll.u32 %v832_v22, %v839_v27  ;;  %p2270_p1 = pnand %p2269_p0, %p2483_p3  ;;  %p2277_p4 = por %p2276_p2, %p2275_p13 }
 0x132   : > { %v842_v38 = vshrl.u32 %v824_v28, %v840_v29  ;;  %v845_v37 = vadd.s32 127, %v844_v31  ;;  %p2271_p11 = pneg %p2270_p1 }
 0x134   : > { %v843_v43 = vor.u32 %v842_v38, %v841_v35  ;;  %v846_v45 = vshll.u32 %v845_v37, 23  ;;  %p2278_p5 = pnand %p2277_p4, %p2271_p11 }
 0x136   : > { %v847_v42 = vor.u32 4788187, %v846_v45  ;;  %v850_v48 = vcvt.s32.f32 %v843_v43  ;;  %v2209_v6 = vpop.eup %2208 }
 0x137   : > { %v2211_v53 = vpop.eup %2210  ;;  %v764_v36 = vxor.u32 2147483648, %v2209_v6 }
 0x138   : > { %v848_v46 = vand.u32 2147483647, %v847_v42  ;;  %v761_v41 = vxor.u32 2147483648, %v2211_v53 }
 0x139   : > { %v765_v13 = vsel %vm763_vm13, %v764_v36, %v2211_v53 }
 0x13a   : > { %v851_v52 = vmul.f32 %v850_v48, %v848_v46  ;;  %v762_v11 = vsel %vm760_vm12, %v2209_v6, %v761_v41 }
 0x13b   : > { %v766_v50 = vsel %vm759_vm14, %v762_v11, %v765_v13 }
 0x13c   : > { %v852_v54 = vxor.u32 2147483648, %v851_v52  ;;  %v767_v12 = vsel %vm756_vm2, nan, %v766_v50 }
 0x13e   : > { %v853_v63 = vsel %vm770_vm10, %v852_v54, %v851_v52 }
 0x13f   : > { %v856_v2 = vsel %vm769_vm11, %v2596_v3, %v853_v63 }
 0x140   : > { %2212 = vcosq.f32 %v856_v2 }
 0x141   : > { %2214 = vsinq.f32 %v856_v2 }
 0x14d   : > { %v2213_v16 = vpop.eup %2212 }
 0x14e   : > { %v2215_v0 = vpop.eup %2214  ;;  %v868_v49 = vxor.u32 2147483648, %v2213_v16 }
 0x14f   : > { %v865_v15 = vxor.u32 2147483648, %v2215_v0 }
 0x150   : > { %v869_v10 = vsel %vm867_vm15, %v868_v49, %v2215_v0 }
 0x151   : > { %v866_v58 = vsel %vm864_vm0, %v2213_v16, %v865_v15 }
 0x152   : > { %v870_v17 = vsel %vm863_vm1, %v866_v58, %v869_v10 }
 0x153   : > { %v871_v18 = vsel %vm860_vm3, nan, %v870_v17 }
 0x154   : > { %v873_v1 = vpack.c.bf16 %v871_v18, %v767_v12 }
 0x156   : > { %886 = vxpose.xlu0.c.b16.end [2/2] (short) %v873_v1, 128 }
 0x1b4   : > { %v893_v62 = vpop.trf.xlu0 }
 0x1b5   : > { %1988 = vmatprep.mubr.msk.bf16.mxu0 %vm913_vm4, %v893_v62 }
 0x1b8   : > { %v894_v9 = vpop.trf.xlu0 }
 0x1b9   : > { %1989 = vmatmul.mubr.msk.bf16.vlgmr.msra.gmra.mxu0 %vm913_vm4, %v894_v9 }
 0x1ba   : > { %2025 = vmatpush3.bf16.msra.mxu0 %v2196_v23 }
 0x1bb   : > { %2026 = vmatprep.subr.bf16.mxu0 %v2197_v47 }
 0x1bc   : > { %v895_v14 = vpop.trf.xlu0 }
 0x1bd   : > { %1992 = vmatprep.mubr.msk.bf16.mxu0 %vm913_vm4, %v895_v14 }
 0x1be   : > { %2027 = vmatpush3.bf16.msra.mxu0 %v2197_v47 }
 0x1c0   : > { %v896_v22 = vpop.trf.xlu0 }
 0x1c1   : > { %1993 = vmatmul.mubr.msk.bf16.gmra.mxu0 %vm913_vm4, %v896_v22 }
 0x1c4   : > { %v897_v44 = vpop.trf.xlu0 }
 0x1c5   : > { %1996 = vmatprep.mubr.msk.bf16.mxu0 %vm913_vm4, %v897_v44 }
 0x1c8   : > { %v898_v3 = vpop.trf.xlu0 }
 0x1c9   : > { %1997 = vmatmul.mubr.msk.bf16.gmra.mxu0 %vm913_vm4, %v898_v3  ;;  %v2198_v3 = vld [vmem:[#allocation5 + $0x8] sm:$0xff]  }
 0x1ca   : > { %2044 = vmatprep.subr.bf16.mxu1 %v2198_v3 }
 0x1cc   : > { %v899_v20 = vpop.trf.xlu0 }
 0x1cd   : > { %2000 = vmatprep.mubr.msk.bf16.mxu0 %vm913_vm4, %v899_v20  ;;  %v2199_v20 = vld [vmem:[#allocation5] sm:$0xff]  }
 0x1d0   : > { %v900_v19 = vpop.trf.xlu0 }
 0x1d1   : > { %2001 = vmatmul.mubr.msk.bf16.gmra.mxu0 %vm913_vm4, %v900_v19 }
 0x279   : > { %v1990_v5 = vpop.f32.mrf.mxu0 }
 0x27a   : > { %v2866_v28 = vadd.f32 %v1990_v5, %v1810_v24 }
 0x27b   : > { %v972_v30 = vpop.f32.mrf.mxu0 }
 0x27c   : > { %v2862_v26 = vadd.f32 %v1810_v24, %v972_v30  ;;  %v1037_v39 = vmax.f32 %v2866_v28, 0.0 }
 0x27d   : > { %v1991_v25 = vpop.f32.mrf.mxu0 }
 0x27e   : > { %v2864_v27 = vadd.f32 %v1991_v25, %v1810_v24  ;;  %v1035_v38 = vmax.f32 %v2862_v26, 0.0 }
 0x27f   : > { %v975_v29 = vpop.f32.mrf.mxu0 }
 0x280   : > { %v2868_v31 = vadd.f32 %v1810_v24, %v975_v29  ;;  %v1038_v33 = vmax.f32 %v2864_v27, 0.0 }
 0x281   : > { %v1994_v35 = vpop.f32.mrf.mxu0 }
 0x282   : > { %v1036_v37 = vmax.f32 %v2868_v31, 0.0  ;;  %v1052_v45 = vpack.c.bf16 %v1038_v33, %v1037_v39  ;;  %v2887_v48 = vadd.f32 %v1994_v35, %v1810_v24 }
 0x283   : > { %v988_v40 = vpop.f32.mrf.mxu0 }
 0x284   : > { %v1051_v43 = vpack.c.bf16 %v1036_v37, %v1035_v38  ;;  %v2882_v42 = vadd.f32 %v1810_v24, %v988_v40  ;;  %v1041_v2 = vmax.f32 %v2887_v48, 0.0 }
 0x285   : > { %v1995_v34 = vpop.f32.mrf.mxu0 }
 0x286   : > { %v2884_v46 = vadd.f32 %v1995_v34, %v1810_v24  ;;  %2008 = vmatprep.mubr.msk.bf16.mxu1 %vm913_vm4, %v1051_v43  ;;  %v1039_v57 = vmax.f32 %v2882_v42, 0.0 }
 0x287   : > { %v991_v32 = vpop.f32.mrf.mxu0  ;;  %2009 = vmatmul.mubr.msk.bf16.vlgmr.msra.gmra.mxu1 %vm913_vm4, %v1052_v45 }
 0x288   : > { %v2890_v52 = vadd.f32 %v1810_v24, %v991_v32  ;;  %v1042_v54 = vmax.f32 %v2884_v46, 0.0  ;;  %2045 = vmatpush3.bf16.msra.mxu1 %v2198_v3 }
 0x289   : > { %v1998_v56 = vpop.f32.mrf.mxu0  ;;  %2046 = vmatprep.subr.bf16.mxu1 %v2199_v20 }
 0x28a   : > { %v1040_v63 = vmax.f32 %v2890_v52, 0.0  ;;  %v1054_v4 = vpack.c.bf16 %v1042_v54, %v1041_v2  ;;  %v2909_v55 = vadd.f32 %v1998_v56, %v1810_v24 }
 0x28b   : > { %v1004_v61 = vpop.f32.mrf.mxu0 }
 0x28c   : > { %v1053_v60 = vpack.c.bf16 %v1040_v63, %v1039_v57  ;;  %v2904_v6 = vadd.f32 %v1810_v24, %v1004_v61  ;;  %v1045_v13 = vmax.f32 %v2909_v55, 0.0  ;;  %2047 = vmatpush3.bf16.msra.mxu1 %v2199_v20 }
 0x28d   : > { %v1999_v7 = vpop.f32.mrf.mxu0 }
 0x28e   : > { %v2906_v53 = vadd.f32 %v1999_v7, %v1810_v24  ;;  %2012 = vmatprep.mubr.msk.bf16.mxu1 %vm913_vm4, %v1053_v60  ;;  %v1043_v16 = vmax.f32 %v2904_v6, 0.0 }
 0x28f   : > { %v1007_v51 = vpop.f32.mrf.mxu0  ;;  %2013 = vmatmul.mubr.msk.bf16.gmra.mxu1 %vm913_vm4, %v1054_v4 }
 0x290   : > { %v2912_v41 = vadd.f32 %v1810_v24, %v1007_v51  ;;  %v1046_v36 = vmax.f32 %v2906_v53, 0.0 }
 0x291   : > { %v2002_v8 = vpop.f32.mrf.mxu0 }
 0x292   : > { %v1044_v11 = vmax.f32 %v2912_v41, 0.0  ;;  %v1056_v15 = vpack.c.bf16 %v1046_v36, %v1045_v13  ;;  %v2931_v17 = vadd.f32 %v2002_v8, %v1810_v24 }
 0x293   : > { %v1020_v0 = vpop.f32.mrf.mxu0 }
 0x294   : > { %v1055_v49 = vpack.c.bf16 %v1044_v11, %v1043_v16  ;;  %v2926_v10 = vadd.f32 %v1810_v24, %v1020_v0  ;;  %v1049_v14 = vmax.f32 %v2931_v17, 0.0 }
 0x295   : > { %v2003_v50 = vpop.f32.mrf.mxu0 }
 0x296   : > { %v2928_v58 = vadd.f32 %v2003_v50, %v1810_v24  ;;  %2016 = vmatprep.mubr.msk.bf16.mxu1 %vm913_vm4, %v1055_v49  ;;  %v1047_v62 = vmax.f32 %v2926_v10, 0.0 }
 0x297   : > { %v1023_v12 = vpop.f32.mrf.mxu0  ;;  %2017 = vmatmul.mubr.msk.bf16.gmra.mxu1 %vm913_vm4, %v1056_v15 }
 0x298   : > { %v2934_v18 = vadd.f32 %v1810_v24, %v1023_v12  ;;  %v1050_v1 = vmax.f32 %v2928_v58, 0.0 }
 0x29a   : > { %v1048_v9 = vmax.f32 %v2934_v18, 0.0  ;;  %v1058_v44 = vpack.c.bf16 %v1050_v1, %v1049_v14 }
 0x29c   : > { %v1057_v22 = vpack.c.bf16 %v1048_v9, %v1047_v62 }
 0x29e   : > { %2020 = vmatprep.mubr.msk.bf16.mxu1 %vm913_vm4, %v1057_v22 }
 0x29f   : > { %2021 = vmatmul.mubr.msk.bf16.gmra.mxu1 %vm913_vm4, %v1058_v44 }
 0x347   : > { %v2010_v19 = vpop.f32.mrf.mxu1 }
 0x348   : > { %v1149_v47 = vadd.f32 %v2010_v19, %v2953_v21 }
 0x349   : > { %v1140_v59 = vpop.f32.mrf.mxu1 }
 0x34a   : > { %v1141_v23 = vadd.f32 %v2953_v21, %v1140_v59  ;;  %v2969_v40 = vadd.f32 %v1149_v47, %v1037_v39 }
 0x34b   : > { %v2011_v5 = vpop.f32.mrf.mxu1 }
 0x34c   : > { %v1152_v30 = vadd.f32 %v2011_v5, %v2953_v21  ;;  %v2960_v25 = vadd.f32 %v1141_v23, %v1035_v38  ;;  %v1221_v32 = vmax.f32 %v2969_v40, 0.0 }
 0x34d   : > { %v1143_v24 = vpop.f32.mrf.mxu1 }
 0x34e   : > { %v2964_v29 = vadd.f32 %v1152_v30, %v1038_v33  ;;  %v1144_v35 = vadd.f32 %v2953_v21, %v1143_v24  ;;  %v1219_v38 = vmax.f32 %v2960_v25, 0.0 }
 0x34f   : > { %v2014_v43 = vpop.f32.mrf.mxu1 }
 0x350   : > { %v2973_v45 = vadd.f32 %v1144_v35, %v1036_v37  ;;  %v1222_v34 = vmax.f32 %v2964_v29, 0.0  ;;  %v1165_v28 = vadd.f32 %v2014_v43, %v2953_v21 }
 0x351   : > { %v1156_v26 = vpop.f32.mrf.mxu1 }
 0x352   : > { %v1220_v27 = vmax.f32 %v2973_v45, 0.0  ;;  %v1157_v33 = vadd.f32 %v2953_v21, %v1156_v26  ;;  %v1236_v56 = vpack.c.bf16 %v1222_v34, %v1221_v32  ;;  %v3002_v51 = vadd.f32 %v1165_v28, %v1041_v2 }
 0x353   : > { %v2015_v39 = vpop.f32.mrf.mxu1 }
 0x354   : > { %v1235_v31 = vpack.c.bf16 %v1220_v27, %v1219_v38  ;;  %v1168_v37 = vadd.f32 %v2015_v39, %v2953_v21  ;;  %v2992_v60 = vadd.f32 %v1157_v33, %v1039_v57  ;;  %v1225_v48 = vmax.f32 %v3002_v51, 0.0 }
 0x355   : > { %v1159_v61 = vpop.f32.mrf.mxu1 }
 0x356   : > { %v2996_v4 = vadd.f32 %v1168_v37, %v1042_v54  ;;  %v1160_v7 = vadd.f32 %v2953_v21, %v1159_v61  ;;  %2028 = vmatprep.mubr.msk.bf16.mxu0 %vm913_vm4, %v1235_v31  ;;  %v1223_v54 = vmax.f32 %v2992_v60, 0.0 }
 0x357   : > { %v2018_v8 = vpop.f32.mrf.mxu1  ;;  %2029 = vmatmul.mubr.msk.bf16.vlgmr.msra.gmra.mxu0 %vm913_vm4, %v1236_v56 }
 0x358   : > { %v3007_v42 = vadd.f32 %v1160_v7, %v1040_v63  ;;  %v1226_v57 = vmax.f32 %v2996_v4, 0.0  ;;  %v1181_v2 = vadd.f32 %v2018_v8, %v2953_v21 }
 0x359   : > { %v1172_v46 = vpop.f32.mrf.mxu1 }
 0x35a   : > { %v1224_v0 = vmax.f32 %v3007_v42, 0.0  ;;  %v1173_v49 = vadd.f32 %v2953_v21, %v1172_v46  ;;  %v1238_v50 = vpack.c.bf16 %v1226_v57, %v1225_v48  ;;  %v3036_v20 = vadd.f32 %v1181_v2, %v1045_v13 }
 0x35b   : > { %v2019_v15 = vpop.f32.mrf.mxu1 }
 0x35c   : > { %v1237_v52 = vpack.c.bf16 %v1224_v0, %v1223_v54  ;;  %v1184_v63 = vadd.f32 %v2019_v15, %v2953_v21  ;;  %v3026_v22 = vadd.f32 %v1173_v49, %v1043_v16  ;;  %v1229_v55 = vmax.f32 %v3036_v20, 0.0 }
 0x35d   : > { %v1175_v12 = vpop.f32.mrf.mxu1 }
 0x35e   : > { %v3030_v44 = vadd.f32 %v1184_v63, %v1046_v36  ;;  %v1176_v3 = vadd.f32 %v2953_v21, %v1175_v12  ;;  %2032 = vmatprep.mubr.msk.bf16.mxu0 %vm913_vm4, %v1237_v52  ;;  %v1227_v36 = vmax.f32 %v3026_v22, 0.0 }
 0x35f   : > { %v2022_v19 = vpop.f32.mrf.mxu1  ;;  %2033 = vmatmul.mubr.msk.bf16.gmra.mxu0 %vm913_vm4, %v1238_v50 }
 0x360   : > { %v3041_v6 = vadd.f32 %v1176_v3, %v1044_v11  ;;  %v1230_v16 = vmax.f32 %v3030_v44, 0.0  ;;  %v1197_v13 = vadd.f32 %v2022_v19, %v2953_v21 }
 0x361   : > { %v1188_v53 = vpop.f32.mrf.mxu1 }
 0x362   : > { %v1228_v59 = vmax.f32 %v3041_v6, 0.0  ;;  %v1189_v23 = vadd.f32 %v2953_v21, %v1188_v53  ;;  %v1240_v5 = vpack.c.bf16 %v1230_v16, %v1229_v55  ;;  %v3070_v26 = vadd.f32 %v1197_v13, %v1049_v14  ;;  %v3094_v14 = vld [vmem:[%s3236_s5 + $0x1] ss:$0 sm:$0xff] }
 0x363   : > { %v2023_v47 = vpop.f32.mrf.mxu1 }
 0x364   : > { %v1239_v41 = vpack.c.bf16 %v1228_v59, %v1227_v36  ;;  %v1200_v11 = vadd.f32 %v2023_v47, %v2953_v21  ;;  %v3060_v24 = vadd.f32 %v1189_v23, %v1047_v62  ;;  %v1233_v62 = vmax.f32 %v3070_v26, 0.0  ;;  %v1848_v26 = vld [vmem:[%s3238_s7] ss:$0 sm:$0xff] }
 0x365   : > { %v1191_v30 = vpop.f32.mrf.mxu1 }
 0x366   : > { %v3064_v35 = vadd.f32 %v1200_v11, %v1050_v1  ;;  %v1192_v43 = vadd.f32 %v2953_v21, %v1191_v30  ;;  %2036 = vmatprep.mubr.msk.bf16.mxu0 %vm913_vm4, %v1239_v41  ;;  %v1231_v58 = vmax.f32 %v3060_v24, 0.0 }
 0x367   : > { %2037 = vmatmul.mubr.msk.bf16.gmra.mxu0 %vm913_vm4, %v1240_v5 }
 0x368   : > { %v3075_v33 = vadd.f32 %v1192_v43, %v1048_v9  ;;  %v1234_v10 = vmax.f32 %v3064_v35, 0.0 }
 0x36a   : > { %v1232_v1 = vmax.f32 %v3075_v33, 0.0  ;;  %v1242_v18 = vpack.c.bf16 %v1234_v10, %v1233_v62 }
 0x36c   : > { %v1241_v17 = vpack.c.bf16 %v1232_v1, %v1231_v58 }
 0x36e   : > { %2040 = vmatprep.mubr.msk.bf16.mxu0 %vm913_vm4, %v1241_v17 }
 0x36f   : > { %2041 = vmatmul.mubr.msk.bf16.gmra.mxu0 %vm913_vm4, %v1242_v18 }
 0x417   : > { %v2030_v9 = vpop.f32.mrf.mxu0 }
 0x418   : > { %v1335_v39 = vadd.f32 %v2030_v9, %v3094_v14 }
 0x419   : > { %v1326_v21 = vpop.f32.mrf.mxu0 }
 0x41a   : > { %v1327_v28 = vadd.f32 %v3094_v14, %v1326_v21  ;;  %v1391_v46 = vadd.f32 %v1335_v39, %v1221_v32 }
 0x41b   : > { %v2031_v31 = vpop.f32.mrf.mxu0 }
 0x41c   : > { %v1338_v37 = vadd.f32 %v2031_v31, %v3094_v14  ;;  %v1389_v61 = vadd.f32 %v1327_v28, %v1219_v38  ;;  %v1407_v25 = vmax.f32 %v1391_v46, 0.0 }
 0x41d   : > { %v1329_v56 = vpop.f32.mrf.mxu0 }
 0x41e   : > { %v1392_v7 = vadd.f32 %v1338_v37, %v1222_v34  ;;  %v1330_v8 = vadd.f32 %v3094_v14, %v1329_v56  ;;  %v1405_v63 = vmax.f32 %v1389_v61, 0.0 }
 0x41f   : > { %v2034_v49 = vpop.f32.mrf.mxu0 }
 0x420   : > { %v1390_v2 = vadd.f32 %v1330_v8, %v1220_v27  ;;  %v1408_v15 = vmax.f32 %v1392_v7, 0.0  ;;  %v1351_v38 = vadd.f32 %v2034_v49, %v3094_v14 }
 0x421   : > { %v1342_v52 = vpop.f32.mrf.mxu0 }
 0x422   : > { %v1406_v50 = vmax.f32 %v1390_v2, 0.0  ;;  %v1343_v12 = vadd.f32 %v3094_v14, %v1342_v52  ;;  %v1422_v19 = vpack.c.bf16 %v1408_v15, %v1407_v25  ;;  %v1395_v53 = vadd.f32 %v1351_v38, %v1225_v48 }
 0x423   : > { %v2035_v29 = vpop.f32.mrf.mxu0 }
 0x424   : > { %v1421_v34 = vpack.c.bf16 %v1406_v50, %v1405_v63  ;;  %v1354_v3 = vadd.f32 %v2035_v29, %v3094_v14  ;;  %v1393_v32 = vadd.f32 %v1343_v12, %v1223_v54 }
 0x425   : > { %v1345_v40 = vpop.f32.mrf.mxu0 }
 0x426   : > { %v1396_v45 = vadd.f32 %v1354_v3, %v1226_v57  ;;  %v1346_v27 = vadd.f32 %v3094_v14, %v1345_v40  ;;  %2048 = vmatprep.mubr.msk.bf16.mxu1 %vm913_vm4, %v1421_v34  ;;  %v1409_v60 = vmax.f32 %v1393_v32, 0.0  ;;  %v1411_v57 = vmax.f32 %v1395_v53, 0.0 }
 0x427   : > { %v2038_v23 = vpop.f32.mrf.mxu0  ;;  %2049 = vmatmul.mubr.msk.bf16.vlgmr.msra.gmra.mxu1 %vm913_vm4, %v1422_v19 }
 0x428   : > { %v1394_v13 = vadd.f32 %v1346_v27, %v1224_v0  ;;  %v1412_v47 = vmax.f32 %v1396_v45, 0.0  ;;  %v1367_v11 = vadd.f32 %v2038_v23, %v3094_v14 }
 0x429   : > { %v1358_v41 = vpop.f32.mrf.mxu0 }
 0x42a   : > { %v1410_v54 = vmax.f32 %v1394_v13, 0.0  ;;  %v1359_v4 = vadd.f32 %v3094_v14, %v1358_v41  ;;  %v1424_v48 = vpack.c.bf16 %v1412_v47, %v1411_v57  ;;  %v1399_v18 = vadd.f32 %v1367_v11, %v1229_v55 }
 0x42b   : > { %v2039_v5 = vpop.f32.mrf.mxu0 }
 0x42c   : > { %v1423_v30 = vpack.c.bf16 %v1410_v54, %v1409_v60  ;;  %v1370_v51 = vadd.f32 %v2039_v5, %v3094_v14  ;;  %v1397_v17 = vadd.f32 %v1359_v4, %v1227_v36 }
 0x42d   : > { %v1361_v43 = vpop.f32.mrf.mxu0 }
 0x42e   : > { %v1400_v42 = vadd.f32 %v1370_v51, %v1230_v16  ;;  %v1362_v0 = vadd.f32 %v3094_v14, %v1361_v43  ;;  %2052 = vmatprep.mubr.msk.bf16.mxu1 %vm913_vm4, %v1423_v30  ;;  %v1413_v22 = vmax.f32 %v1397_v17, 0.0  ;;  %v1415_v16 = vmax.f32 %v1399_v18, 0.0 }
 0x42f   : > { %v2042_v9 = vpop.f32.mrf.mxu0  ;;  %2053 = vmatmul.mubr.msk.bf16.gmra.mxu1 %vm913_vm4, %v1424_v48 }
 0x430   : > { %v1398_v21 = vadd.f32 %v1362_v0, %v1228_v59  ;;  %v1416_v28 = vmax.f32 %v1400_v42, 0.0  ;;  %v1383_v31 = vadd.f32 %v2042_v9, %v3094_v14 }
 0x431   : > { %v1374_v39 = vpop.f32.mrf.mxu0 }
 0x432   : > { %v1414_v36 = vmax.f32 %v1398_v21, 0.0  ;;  %v1375_v44 = vadd.f32 %v3094_v14, %v1374_v39  ;;  %v1426_v55 = vpack.c.bf16 %v1416_v28, %v1415_v16  ;;  %v1403_v8 = vadd.f32 %v1383_v31, %v1233_v62 }
 0x433   : > { %v2043_v37 = vpop.f32.mrf.mxu0 }
 0x434   : > { %v1425_v56 = vpack.c.bf16 %v1414_v36, %v1413_v22  ;;  %v1386_v20 = vadd.f32 %v2043_v37, %v3094_v14  ;;  %v1401_v7 = vadd.f32 %v1375_v44, %v1231_v58  ;;  %v1419_v2 = vmax.f32 %v1403_v8, 0.0 }
 0x435   : > { %v1377_v61 = vpop.f32.mrf.mxu0 }
 0x436   : > { %v1404_v6 = vadd.f32 %v1386_v20, %v1234_v10  ;;  %v1378_v59 = vadd.f32 %v3094_v14, %v1377_v61  ;;  %2056 = vmatprep.mubr.msk.bf16.mxu1 %vm913_vm4, %v1425_v56  ;;  %v1417_v24 = vmax.f32 %v1401_v7, 0.0 }
 0x437   : > { %2057 = vmatmul.mubr.msk.bf16.gmra.mxu1 %vm913_vm4, %v1426_v55 }
 0x438   : > { %v1402_v46 = vadd.f32 %v1378_v59, %v1232_v1  ;;  %v1420_v49 = vmax.f32 %v1404_v6, 0.0 }
 0x43a   : > { %v1418_v58 = vmax.f32 %v1402_v46, 0.0  ;;  %v1428_v15 = vpack.c.bf16 %v1420_v49, %v1419_v2 }
 0x43c   : > { %v1427_v35 = vpack.c.bf16 %v1418_v58, %v1417_v24 }
 0x43e   : > { %2060 = vmatprep.mubr.msk.bf16.mxu1 %vm913_vm4, %v1427_v35 }
 0x43f   : > { %2061 = vmatmul.mubr.msk.bf16.gmra.mxu1 %vm913_vm4, %v1428_v15 }
 0x4e7   : > { %v2050_v10 = vpop.f32.mrf.mxu1 }
 0x4e8   : > { %v1519_v1 = vadd.f32 %v2050_v10, %v1848_v26 }
 0x4e9   : > { %v1510_v62 = vpop.f32.mrf.mxu1 }
 0x4ea   : > { %v1511_v63 = vadd.f32 %v1848_v26, %v1510_v62 }
 0x4eb   : > { %v2051_v33 = vpop.f32.mrf.mxu1 }
 0x4ec   : > { %v1522_v14 = vadd.f32 %v2051_v33, %v1848_v26 }
 0x4ed   : > { %v1513_v52 = vpop.f32.mrf.mxu1 }
 0x4ee   : > { %v1905_v50 = vpack.c.bf16 %v1522_v14, %v1519_v1  ;;  %v1514_v12 = vadd.f32 %v1848_v26, %v1513_v52 }
 0x4ef   : > { %v2054_v25 = vpop.f32.mrf.mxu1 }
 0x4f0   : > { %1937 = vst [vmem:[%s3158_s22 + $0x8] sm:$0xff] %v1905_v50   ;;  %v1900_v38 = vpack.c.bf16 %v1514_v12, %v1511_v63  ;;  %v1535_v3 = vadd.f32 %v2054_v25, %v1848_v26 }
 0x4f1   : > { %v1526_v29 = vpop.f32.mrf.mxu1 }
 0x4f2   : > { %1901 = vst [vmem:[%s3158_s22] sm:$0xff] %v1900_v38   ;;  %v1527_v32 = vadd.f32 %v1848_v26, %v1526_v29 }
 0x4f3   : > { %v2055_v34 = vpop.f32.mrf.mxu1 }
 0x4f4   : > { %v1538_v19 = vadd.f32 %v2055_v34, %v1848_v26 }
 0x4f5   : > { %v1529_v40 = vpop.f32.mrf.mxu1 }
 0x4f6   : > { %v1915_v45 = vpack.c.bf16 %v1538_v19, %v1535_v3  ;;  %v1530_v27 = vadd.f32 %v1848_v26, %v1529_v40 }
 0x4f7   : > { %v2058_v53 = vpop.f32.mrf.mxu1 }
 0x4f8   : > { %1939 = vst [vmem:[%s3158_s22 + $0x18] sm:$0xff] %v1915_v45   ;;  %v1910_v23 = vpack.c.bf16 %v1530_v27, %v1527_v32  ;;  %v1551_v41 = vadd.f32 %v2058_v53, %v1848_v26 }
 0x4f9   : > { %v1542_v13 = vpop.f32.mrf.mxu1 }
 0x4fa   : > { %1938 = vst [vmem:[%s3158_s22 + $0x10] sm:$0xff] %v1910_v23   ;;  %v1543_v4 = vadd.f32 %v1848_v26, %v1542_v13 }
 0x4fb   : > { %v2059_v47 = vpop.f32.mrf.mxu1 }
 0x4fc   : > { %v1554_v60 = vadd.f32 %v2059_v47, %v1848_v26 }
 0x4fd   : > { %v1545_v54 = vpop.f32.mrf.mxu1 }
 0x4fe   : > { %v1925_v57 = vpack.c.bf16 %v1554_v60, %v1551_v41  ;;  %v1546_v11 = vadd.f32 %v1848_v26, %v1545_v54 }
 0x4ff   : > { %v2062_v5 = vpop.f32.mrf.mxu1 }
 0x500   : > { %1941 = vst [vmem:[%s3158_s22 + $0x28] sm:$0xff] %v1925_v57   ;;  %v1920_v30 = vpack.c.bf16 %v1546_v11, %v1543_v4  ;;  %v1567_v43 = vadd.f32 %v2062_v5, %v1848_v26 }
 0x501   : > { %v1558_v51 = vpop.f32.mrf.mxu1 }
 0x502   : > { %1940 = vst [vmem:[%s3158_s22 + $0x20] sm:$0xff] %v1920_v30   ;;  %v1559_v0 = vadd.f32 %v1848_v26, %v1558_v51 }
 0x503   : > { %v2063_v48 = vpop.f32.mrf.mxu1 }
 0x504   : > { %v1570_v17 = vadd.f32 %v2063_v48, %v1848_v26 }
 0x505   : > { %v1561_v42 = vpop.f32.mrf.mxu1 }
 0x506   : > { %v1935_v18 = vpack.c.bf16 %v1570_v17, %v1567_v43  ;;  %v1562_v9 = vadd.f32 %v1848_v26, %v1561_v42 }
 0x508   : > { %1943 = vst [vmem:[%s3158_s22 + $0x38] sm:$0xff] %v1935_v18   ;;  %v1930_v21 = vpack.c.bf16 %v1562_v9, %v1559_v0 }
 0x50a   : > { %1942 = vst [vmem:[%s3158_s22 + $0x30] sm:$0xff] %v1930_v21  }
 0x50b   : > { %2281 = shalt.err (!%p2278_p5)
}
 0x50c   : > { %s2282_s14 = scalar_lea.hbm %s3174_s15, 1024  ;;  %s2286_s13 = scalar_lea.hbm %s3239_s8, 4096 }
 0x50d   : > { %p2283_p6 = scmp.ne.s32.totalorder %s3174_s15, %s2282_s14  ;;  %p2287_p10 = scmp.lt.s32.totalorder %s3174_s15, %s3239_s8 }
 0x50e   : > { %p2288_p12 = scmp.lt.s32.totalorder %s2286_s13, %s2282_s14 }
 0x50f   : > { %p2284_p7 = pnand %p2283_p6, %p2483_p3 }
 0x510   : > { %p2289_p0 = por %p2288_p12, %p2287_p10 }
 0x511   : > { %p2285_p9 = pneg %p2284_p7 }
 0x513   : > { %p2290_p1 = pnand %p2289_p0, %p2285_p9 }
 0x515   : > { %2293 = shalt.err (!%p2290_p1)
}
 0x516   : > { %s2384_s30 = smov 64   ;;  %s2385_s9 = smov 4  }
 0x517   : > { %2088 = dma.vmem_to_hbm [thread:$0]  (%p2483_p3), %s3169_s11, 1024, %s3174_s15, %s3180_s16, %s2384_s30, %s2384_s30, %s2385_s9  }
 0x518 PF: > { %p2105_p11 = scmp.ge.s32.totalorder %s2368_s12, 2  ;;  %s1684_s23 = sand.u32 1, %s2340_s27  }
 0x519   : > { %s1685_s24 = scalar_lea.sflag [#allocation4], %s1684_s23 }
 0x51a   : > { %p2098_p13 = pnand %p2105_p11, %p2492_p8 }
 0x51c   : > { %p2099_p2 = pneg %p2098_p13 }
 0x51e   : > { %2335 = dma.done.wait (%p2099_p2), %s1685_s24, 1024  }
 0x51f   : > { %2337 = vsyncadd (%p2099_p2), %s1685_s24, 4294966272  ;;  %s23_s12 = sadd.s32 1, %s2368_s12   ;;  %s3259_s30 = sld [smem:[#allocation11_spill]] }
 0x520   : > { %p20_p4 = scmp.ge.s32.totalorder %s23_s12, 6   ;;  %s3260_s9 = sld [smem:[#allocation12_spill]] }
 0x521   : > { %s3261_s10 = sld [smem:[#allocation13_spill]]  ;;  %s3263_s27 = smov %s2344_s28 }
 0x522   : > { %s3262_s11 = sld [smem:[#allocation14_spill]]  ;;  %s3264_s28 = smov %s2348_s29 }
 0x523   : > { %s3265_s29 = smov %s2510_s25  ;;  %22 = sbr.rel (!%p20_p4) target bundleno = 7 (0x7), region = 101 }
 0x528   :  { %1690 = vsyncpa [#allocation3], 1 }
 0x529   :  { %1692 = vsyncpa [#allocation3 + $0x1], 1 }
 0x52a   :  { %1693 = vsyncpa [#allocation6], 1 }
 0x52b   :  { %1694 = vsyncpa [#allocation4], 1 }
 0x52c   :  { %1696 = vsyncpa [#allocation4 + $0x1], 1 }

</bundles_post_ra>
